<compile_context>
chip_gen: v5e
topology: v5e:2x2
jax: 0.10.0
libtpu: 0.0.40
codegen_flags: <defaults>
</compile_context>

<pallas_src>
import functools

import jax
import jax.numpy as jnp
from jax import lax
from jax.experimental import pallas as pl
from jax.experimental.pallas import tpu as pltpu


def _round_up(v, m):
    return (v + m - 1) // m * m


def _make_rnn_kernel(num_layers: int, seq_len: int, unroll: bool):
    L, T = num_layers, seq_len

    def kernel(x_ref, wih0_ref, whh_ref, wihr_ref, bias_ref, wfc_ref, bfc_ref,
               out_ref, xproj_ref, h_ref):
        Bt = x_ref.shape[1]           # batch tile
        D = x_ref.shape[2]
        H = h_ref.shape[-1]

        # ---- Prologue: hoisted layer-0 input projection (off the serial
        # critical path).  One big MXU GEMM for all timesteps, bias0 folded in.
        x2d = x_ref[...].reshape(T * Bt, D)
        xproj = jnp.dot(x2d, wih0_ref[...], preferred_element_type=jnp.float32)
        xproj_ref[...] = xproj.reshape(T, Bt, H) + bias_ref[0]

        # h0 = 0 for every layer.
        h_ref[...] = jnp.zeros_like(h_ref[...])

        # Hoist the (1, H) -> (Bt, H) bias broadcasts out of the time loop.
        layer_bias = [jnp.broadcast_to(bias_ref[l], (Bt, H)) for l in range(1, L)]

        # ---- Serial recurrence over time, fully in-kernel -------------------
        def step(t, carry):
            # Recurrent contributions for every layer first: they depend only
            # on the previous step's state, so all L matmuls can pipeline
            # through the MXU before (and during) the serial inter-layer chain.
            rec = [jnp.dot(h_ref[l], whh_ref[l],
                           preferred_element_type=jnp.float32)
                   for l in range(L)]

            # Layer 0: only xproj[t] + rec_0 is left on the critical path.
            h0 = jnp.maximum(xproj_ref[t] + rec[0], 0.0)
            h_ref[0] = h0
            inp = h0

            # Layers 1..L-1: one input matmul per layer on the serial chain;
            # the recurrent matmul (rec[l]) is already in flight.
            for l in range(1, L):
                hn = jnp.maximum(
                    jnp.dot(inp, wihr_ref[l - 1],
                            preferred_element_type=jnp.float32)
                    + rec[l] + layer_bias[l - 1],
                    0.0,
                )
                h_ref[l] = hn
                inp = hn
            return carry

        lax.fori_loop(0, T, step, 0, unroll=unroll)

        # ---- Final Linear on the last timestep of the top layer -------------
        out_ref[...] = (
            jnp.dot(h_ref[L - 1], wfc_ref[...], preferred_element_type=jnp.float32)
            + bfc_ref[...]
        )

    return kernel


@functools.partial(jax.jit, static_argnames=("num_layers",))
def rnn_model_forward(x_btd, params, *, num_layers):
    """x_btd: (B, T, D) float32 (batch_first, like the PyTorch module)."""
    B, T, D = x_btd.shape
    L = num_layers
    H = params["whh"].shape[-1]
    O = params["wfc"].shape[-1]
    f32 = jnp.float32

    # ---- Pad to TPU-friendly granularity (zero padding keeps math exact) ----
    H_pad = _round_up(H, 128)
    D_pad = _round_up(D, 128)
    O_pad = _round_up(O, 128)
    B_pad = _round_up(B, 8)
    if B_pad > 128:                       # tile big batches for the parallel axis
        B_pad = _round_up(B_pad, 128)
        bt = 128
    else:
        bt = B_pad

    def pad2(a, r, c):
        return jnp.pad(a.astype(f32), ((0, r - a.shape[0]), (0, c - a.shape[1])))

    wih0 = pad2(params["wih0"], D_pad, H_pad)                          # (D_pad, H_pad)
    whh = jnp.pad(params["whh"].astype(f32),
                  ((0, 0), (0, H_pad - H), (0, H_pad - H)))            # (L, H_pad, H_pad)
    bias = jnp.pad(params["bias"].astype(f32),
                   ((0, 0), (0, 0), (0, H_pad - H)))                   # (L, 1, H_pad)
    wfc = pad2(params["wfc"], H_pad, O_pad)                            # (H_pad, O_pad)
    bfc = jnp.pad(params["bfc"].astype(f32), ((0, 0), (0, O_pad - O))) # (1, O_pad)

    # Input->hidden weights for layers 1..L-1 (dummy zeros when L == 1).
    if L > 1:
        wihr = jnp.pad(params["wihr"].astype(f32)[: L - 1],
                       ((0, 0), (0, H_pad - H), (0, H_pad - H)))       # (L-1, H_pad, H_pad)
    else:
        wihr = jnp.zeros((1, H_pad, H_pad), f32)                       # unused when L==1

    # Time-major, padded activations: (T, B_pad, D_pad)
    x_tbd = jnp.transpose(x_btd.astype(f32), (1, 0, 2))
    x_tbd = jnp.pad(x_tbd, ((0, 0), (0, B_pad - B), (0, D_pad - D)))

    # Single batch-tile grid axis ("parallel" -> megacore split on v7x);
    # the serial time recurrence is entirely inside the kernel.
    grid = (B_pad // bt,)
    kernel = _make_rnn_kernel(L, T, unroll=T <= 32)

    out = pl.pallas_call(
        kernel,
        out_shape=jax.ShapeDtypeStruct((B_pad, O_pad), f32),
        grid_spec=pltpu.PrefetchScalarGridSpec(
            num_scalar_prefetch=0,
            grid=grid,
            in_specs=[
                pl.BlockSpec((T, bt, D_pad), lambda b: (0, b, 0)),        # x (batch tile)
                pl.BlockSpec((D_pad, H_pad), lambda b: (0, 0)),           # W_ih layer 0
                pl.BlockSpec((L, H_pad, H_pad), lambda b: (0, 0, 0)),     # W_hh all layers
                pl.BlockSpec((max(L - 1, 1), H_pad, H_pad),
                             lambda b: (0, 0, 0)),                        # W_ih layers > 0
                pl.BlockSpec((L, 1, H_pad), lambda b: (0, 0, 0)),         # folded biases
                pl.BlockSpec((H_pad, O_pad), lambda b: (0, 0)),           # fc weight
                pl.BlockSpec((1, O_pad), lambda b: (0, 0)),               # fc bias
            ],
            out_specs=pl.BlockSpec((bt, O_pad), lambda b: (b, 0)),
            scratch_shapes=[
                pltpu.VMEM((T, bt, H_pad), jnp.float32),  # hoisted X@W_ih0 + b0
                pltpu.VMEM((L, bt, H_pad), jnp.float32),  # per-layer hidden state
            ],
        ),
        compiler_params=pltpu.CompilerParams(
            dimension_semantics=("parallel",),
            vmem_limit_bytes=32 * 1024 * 1024,
        ),
    )(x_tbd, wih0, whh, wihr, bias, wfc, bfc)

    return out[:B, :O]


def rnn_model_reference(x_btd, params, num_layers):
    """Pure-JAX reference mirroring the PyTorch forward pass."""
    B, T, D = x_btd.shape
    L = num_layers
    H = params["whh"].shape[-1]
    h = jnp.zeros((L, B, H), jnp.float32)
    for t in range(T):
        inp = x_btd[:, t, :]
        new_h = []
        for l in range(L):
            w_in = params["wih0"] if l == 0 else params["wihr"][l - 1]
            hn = jax.nn.relu(inp @ w_in + h[l] @ params["whh"][l] + params["bias"][l, 0])
            new_h.append(hn)
            inp = hn
        h = jnp.stack(new_h)
    return inp @ params["wfc"] + params["bfc"][0]


if __name__ == "__main__":
    # Small shapes consistent with RNNModel(input_dim, hidden_dim, layer_dim, output_dim)
    B, T = 2, 8                 # batch, sequence length
    D, H, L, O = 16, 32, 2, 4   # input_dim, hidden_dim, layer_dim, output_dim

    key = jax.random.PRNGKey(0)
    ks = jax.random.split(key, 7)
    s = 1.0 / jnp.sqrt(jnp.float32(H))

    def uni(k, shape):
        return jax.random.uniform(k, shape, jnp.float32, -s, s)

    params = dict(
        wih0=uni(ks[0], (D, H)),                 # input->hidden, layer 0
        wihr=uni(ks[1], (max(L - 1, 1), H, H)),  # input->hidden, layers 1..L-1
        whh=uni(ks[2], (L, H, H)),               # hidden->hidden, all layers
        bias=uni(ks[3], (L, 1, H)),              # b_ih + b_hh folded per layer
        wfc=uni(ks[4], (H, O)),                  # final Linear weight
        bfc=uni(ks[5], (1, O)),                  # final Linear bias
    )
    x = jax.random.normal(ks[6], (B, T, D), jnp.float32)

    out = rnn_model_forward(x, params, num_layers=L)
    out = jax.block_until_ready(out)

    ref = rnn_model_reference(x, params, L)
    assert out.shape == (B, O)
    assert jnp.allclose(out, ref, atol=1e-5, rtol=1e-5), "mismatch vs reference"

    print("KERNEL_OK")
</pallas_src>

<mosaic_0001>
module attributes {stable_mosaic.version = 11 : i64} {
  func.func @kernel(%arg0: i32, %arg1: memref<8x8x128xf32, #tpu.memory_space<vmem>>, %arg2: memref<128x128xf32, #tpu.memory_space<vmem>>, %arg3: memref<2x128x128xf32, #tpu.memory_space<vmem>>, %arg4: memref<1x128x128xf32, #tpu.memory_space<vmem>>, %arg5: memref<2x1x128xf32, #tpu.memory_space<vmem>>, %arg6: memref<128x128xf32, #tpu.memory_space<vmem>>, %arg7: memref<1x128xf32, #tpu.memory_space<vmem>>, %arg8: memref<8x128xf32, #tpu.memory_space<vmem>>, %arg9: memref<8x8x128xf32, #tpu.memory_space<vmem>>, %arg10: memref<2x8x128xf32, #tpu.memory_space<vmem>>) attributes {dimension_semantics = [#tpu.dimension_semantics<parallel>], iteration_bounds = array<i64: 1>, scalar_prefetch = 0 : i64, scratch_operands = 2 : i64, tpu.core_type = #tpu.core_type<tc>, window_params = [{transform_indices = @transform_0, window_bounds = array<i64: 8, 8, 128>}, {pipeline_mode = #tpu.pipeline_mode<synchronous>, transform_indices = @transform_1, window_bounds = array<i64: 128, 128>}, {pipeline_mode = #tpu.pipeline_mode<synchronous>, transform_indices = @transform_2, window_bounds = array<i64: 2, 128, 128>}, {pipeline_mode = #tpu.pipeline_mode<synchronous>, transform_indices = @transform_3, window_bounds = array<i64: 1, 128, 128>}, {pipeline_mode = #tpu.pipeline_mode<synchronous>, transform_indices = @transform_4, window_bounds = array<i64: 2, 1, 128>}, {pipeline_mode = #tpu.pipeline_mode<synchronous>, transform_indices = @transform_5, window_bounds = array<i64: 128, 128>}, {pipeline_mode = #tpu.pipeline_mode<synchronous>, transform_indices = @transform_6, window_bounds = array<i64: 1, 128>}, {transform_indices = @transform_7, window_bounds = array<i64: 8, 128>}]} {
    %c0 = arith.constant 0 : index
    %c0_0 = arith.constant 0 : index
    %c0_1 = arith.constant 0 : index
    %0 = vector.load %arg1[%c0, %c0_0, %c0_1] : memref<8x8x128xf32, #tpu.memory_space<vmem>>, vector<8x8x128xf32>
    %1 = vector.shape_cast %0 : vector<8x8x128xf32> to vector<64x128xf32>
    %c0_2 = arith.constant 0 : index
    %c0_3 = arith.constant 0 : index
    %2 = vector.load %arg2[%c0_2, %c0_3] : memref<128x128xf32, #tpu.memory_space<vmem>>, vector<128x128xf32>
    %cst = arith.constant dense<0.000000e+00> : vector<64x128xf32>
    %3 = tpu.matmul %1, %2, %cst {dimension_numbers = #tpu.dot_dimension_numbers<[1], [0], [0], [1], [0, 0, 1, 1], [], []>} : vector<64x128xf32>, vector<128x128xf32>, vector<64x128xf32> -> vector<64x128xf32>
    %4 = vector.shape_cast %3 : vector<64x128xf32> to vector<8x8x128xf32>
    %c0_4 = arith.constant 0 : index
    %c0_5 = arith.constant 0 : index
    %c0_6 = arith.constant 0 : index
    %5 = vector.load %arg5[%c0_4, %c0_5, %c0_6] : memref<2x1x128xf32, #tpu.memory_space<vmem>>, vector<1x1x128xf32>
    %6 = vector.shape_cast %5 : vector<1x1x128xf32> to vector<1x128xf32>
    %7 = vector.shape_cast %6 : vector<1x128xf32> to vector<1x1x128xf32>
    %8 = vector.broadcast %7 : vector<1x1x128xf32> to vector<8x8x128xf32>
    %9 = arith.addf %4, %8 : vector<8x8x128xf32>
    %c0_7 = arith.constant 0 : index
    %c0_8 = arith.constant 0 : index
    %c0_9 = arith.constant 0 : index
    %10 = vector.load %arg9[%c0_7, %c0_8, %c0_9] : memref<8x8x128xf32, #tpu.memory_space<vmem>>, vector<8x8x128xf32>
    tpu.vector_store %arg9[%c0_7, %c0_8, %c0_9], %9 {strides = array<i32>} : memref<8x8x128xf32, #tpu.memory_space<vmem>>, vector<8x8x128xf32>,
    %cst_10 = arith.constant 0.000000e+00 : f32
    %11 = vector.broadcast %cst_10 : f32 to vector<2x8x128xf32>
    %c0_11 = arith.constant 0 : index
    %c0_12 = arith.constant 0 : index
    %c0_13 = arith.constant 0 : index
    %12 = vector.load %arg10[%c0_11, %c0_12, %c0_13] : memref<2x8x128xf32, #tpu.memory_space<vmem>>, vector<2x8x128xf32>
    tpu.vector_store %arg10[%c0_11, %c0_12, %c0_13], %11 {strides = array<i32>} : memref<2x8x128xf32, #tpu.memory_space<vmem>>, vector<2x8x128xf32>,
    %c1 = arith.constant 1 : index
    %c0_14 = arith.constant 0 : index
    %c0_15 = arith.constant 0 : index
    %13 = vector.load %arg5[%c1, %c0_14, %c0_15] : memref<2x1x128xf32, #tpu.memory_space<vmem>>, vector<1x1x128xf32>
    %14 = vector.shape_cast %13 : vector<1x1x128xf32> to vector<1x128xf32>
    %15 = vector.shape_cast %14 : vector<1x128xf32> to vector<1x128xf32>
    %16 = vector.broadcast %15 : vector<1x128xf32> to vector<8x128xf32>
    %c0_i32 = arith.constant 0 : i32
    %c0_16 = arith.constant 0 : index
    %c0_17 = arith.constant 0 : index
    %c0_18 = arith.constant 0 : index
    %17 = vector.load %arg10[%c0_16, %c0_17, %c0_18] : memref<2x8x128xf32, #tpu.memory_space<vmem>>, vector<1x8x128xf32>
    %18 = vector.shape_cast %17 : vector<1x8x128xf32> to vector<8x128xf32>
    %c0_19 = arith.constant 0 : index
    %c0_20 = arith.constant 0 : index
    %c0_21 = arith.constant 0 : index
    %19 = vector.load %arg3[%c0_19, %c0_20, %c0_21] : memref<2x128x128xf32, #tpu.memory_space<vmem>>, vector<1x128x128xf32>
    %20 = vector.shape_cast %19 : vector<1x128x128xf32> to vector<128x128xf32>
    %cst_22 = arith.constant dense<0.000000e+00> : vector<8x128xf32>
    %21 = tpu.matmul %18, %20, %cst_22 {dimension_numbers = #tpu.dot_dimension_numbers<[1], [0], [0], [1], [0, 0, 1, 1], [], []>} : vector<8x128xf32>, vector<128x128xf32>, vector<8x128xf32> -> vector<8x128xf32>
    %c1_23 = arith.constant 1 : index
    %c0_24 = arith.constant 0 : index
    %c0_25 = arith.constant 0 : index
    %22 = vector.load %arg10[%c1_23, %c0_24, %c0_25] : memref<2x8x128xf32, #tpu.memory_space<vmem>>, vector<1x8x128xf32>
    %23 = vector.shape_cast %22 : vector<1x8x128xf32> to vector<8x128xf32>
    %c1_26 = arith.constant 1 : index
    %c0_27 = arith.constant 0 : index
    %c0_28 = arith.constant 0 : index
    %24 = vector.load %arg3[%c1_26, %c0_27, %c0_28] : memref<2x128x128xf32, #tpu.memory_space<vmem>>, vector<1x128x128xf32>
    %25 = vector.shape_cast %24 : vector<1x128x128xf32> to vector<128x128xf32>
    %cst_29 = arith.constant dense<0.000000e+00> : vector<8x128xf32>
    %26 = tpu.matmul %23, %25, %cst_29 {dimension_numbers = #tpu.dot_dimension_numbers<[1], [0], [0], [1], [0, 0, 1, 1], [], []>} : vector<8x128xf32>, vector<128x128xf32>, vector<8x128xf32> -> vector<8x128xf32>
    %27 = arith.index_cast %c0_i32 : i32 to index
    %c0_30 = arith.constant 0 : index
    %c0_31 = arith.constant 0 : index
    %28 = vector.load %arg9[%27, %c0_30, %c0_31] : memref<8x8x128xf32, #tpu.memory_space<vmem>>, vector<1x8x128xf32>
    %29 = vector.shape_cast %28 : vector<1x8x128xf32> to vector<8x128xf32>
    %30 = arith.addf %29, %21 : vector<8x128xf32>
    %cst_32 = arith.constant 0.000000e+00 : f32
    %31 = vector.broadcast %cst_32 : f32 to vector<8x128xf32>
    %32 = arith.maximumf %30, %31 : vector<8x128xf32>
    %c0_33 = arith.constant 0 : index
    %c0_34 = arith.constant 0 : index
    %c0_35 = arith.constant 0 : index
    %33 = vector.load %arg10[%c0_33, %c0_34, %c0_35] : memref<2x8x128xf32, #tpu.memory_space<vmem>>, vector<1x8x128xf32>
    %34 = vector.shape_cast %33 : vector<1x8x128xf32> to vector<8x128xf32>
    %35 = vector.shape_cast %32 : vector<8x128xf32> to vector<1x8x128xf32>
    tpu.vector_store %arg10[%c0_33, %c0_34, %c0_35], %35 {strides = array<i32>} : memref<2x8x128xf32, #tpu.memory_space<vmem>>, vector<1x8x128xf32>,
    %c0_36 = arith.constant 0 : index
    %c0_37 = arith.constant 0 : index
    %c0_38 = arith.constant 0 : index
    %36 = vector.load %arg4[%c0_36, %c0_37, %c0_38] : memref<1x128x128xf32, #tpu.memory_space<vmem>>, vector<1x128x128xf32>
    %37 = vector.shape_cast %36 : vector<1x128x128xf32> to vector<128x128xf32>
    %cst_39 = arith.constant dense<0.000000e+00> : vector<8x128xf32>
    %38 = tpu.matmul %32, %37, %cst_39 {dimension_numbers = #tpu.dot_dimension_numbers<[1], [0], [0], [1], [0, 0, 1, 1], [], []>} : vector<8x128xf32>, vector<128x128xf32>, vector<8x128xf32> -> vector<8x128xf32>
    %39 = arith.addf %38, %26 : vector<8x128xf32>
    %40 = arith.addf %39, %16 : vector<8x128xf32>
    %cst_40 = arith.constant 0.000000e+00 : f32
    %41 = vector.broadcast %cst_40 : f32 to vector<8x128xf32>
    %42 = arith.maximumf %40, %41 : vector<8x128xf32>
    %c1_41 = arith.constant 1 : index
    %c0_42 = arith.constant 0 : index
    %c0_43 = arith.constant 0 : index
    %43 = vector.load %arg10[%c1_41, %c0_42, %c0_43] : memref<2x8x128xf32, #tpu.memory_space<vmem>>, vector<1x8x128xf32>
    %44 = vector.shape_cast %43 : vector<1x8x128xf32> to vector<8x128xf32>
    %45 = vector.shape_cast %42 : vector<8x128xf32> to vector<1x8x128xf32>
    tpu.vector_store %arg10[%c1_41, %c0_42, %c0_43], %45 {strides = array<i32>} : memref<2x8x128xf32, #tpu.memory_space<vmem>>, vector<1x8x128xf32>,
    %c1_i32 = arith.constant 1 : i32
    %c0_44 = arith.constant 0 : index
    %c0_45 = arith.constant 0 : index
    %c0_46 = arith.constant 0 : index
    %46 = vector.load %arg10[%c0_44, %c0_45, %c0_46] : memref<2x8x128xf32, #tpu.memory_space<vmem>>, vector<1x8x128xf32>
    %47 = vector.shape_cast %46 : vector<1x8x128xf32> to vector<8x128xf32>
    %c0_47 = arith.constant 0 : index
    %c0_48 = arith.constant 0 : index
    %c0_49 = arith.constant 0 : index
    %48 = vector.load %arg3[%c0_47, %c0_48, %c0_49] : memref<2x128x128xf32, #tpu.memory_space<vmem>>, vector<1x128x128xf32>
    %49 = vector.shape_cast %48 : vector<1x128x128xf32> to vector<128x128xf32>
    %cst_50 = arith.constant dense<0.000000e+00> : vector<8x128xf32>
    %50 = tpu.matmul %47, %49, %cst_50 {dimension_numbers = #tpu.dot_dimension_numbers<[1], [0], [0], [1], [0, 0, 1, 1], [], []>} : vector<8x128xf32>, vector<128x128xf32>, vector<8x128xf32> -> vector<8x128xf32>
    %c1_51 = arith.constant 1 : index
    %c0_52 = arith.constant 0 : index
    %c0_53 = arith.constant 0 : index
    %51 = vector.load %arg10[%c1_51, %c0_52, %c0_53] : memref<2x8x128xf32, #tpu.memory_space<vmem>>, vector<1x8x128xf32>
    %52 = vector.shape_cast %51 : vector<1x8x128xf32> to vector<8x128xf32>
    %c1_54 = arith.constant 1 : index
    %c0_55 = arith.constant 0 : index
    %c0_56 = arith.constant 0 : index
    %53 = vector.load %arg3[%c1_54, %c0_55, %c0_56] : memref<2x128x128xf32, #tpu.memory_space<vmem>>, vector<1x128x128xf32>
    %54 = vector.shape_cast %53 : vector<1x128x128xf32> to vector<128x128xf32>
    %cst_57 = arith.constant dense<0.000000e+00> : vector<8x128xf32>
    %55 = tpu.matmul %52, %54, %cst_57 {dimension_numbers = #tpu.dot_dimension_numbers<[1], [0], [0], [1], [0, 0, 1, 1], [], []>} : vector<8x128xf32>, vector<128x128xf32>, vector<8x128xf32> -> vector<8x128xf32>
    %56 = arith.index_cast %c1_i32 : i32 to index
    %c0_58 = arith.constant 0 : index
    %c0_59 = arith.constant 0 : index
    %57 = vector.load %arg9[%56, %c0_58, %c0_59] : memref<8x8x128xf32, #tpu.memory_space<vmem>>, vector<1x8x128xf32>
    %58 = vector.shape_cast %57 : vector<1x8x128xf32> to vector<8x128xf32>
    %59 = arith.addf %58, %50 : vector<8x128xf32>
    %cst_60 = arith.constant 0.000000e+00 : f32
    %60 = vector.broadcast %cst_60 : f32 to vector<8x128xf32>
    %61 = arith.maximumf %59, %60 : vector<8x128xf32>
    %c0_61 = arith.constant 0 : index
    %c0_62 = arith.constant 0 : index
    %c0_63 = arith.constant 0 : index
    %62 = vector.load %arg10[%c0_61, %c0_62, %c0_63] : memref<2x8x128xf32, #tpu.memory_space<vmem>>, vector<1x8x128xf32>
    %63 = vector.shape_cast %62 : vector<1x8x128xf32> to vector<8x128xf32>
    %64 = vector.shape_cast %61 : vector<8x128xf32> to vector<1x8x128xf32>
    tpu.vector_store %arg10[%c0_61, %c0_62, %c0_63], %64 {strides = array<i32>} : memref<2x8x128xf32, #tpu.memory_space<vmem>>, vector<1x8x128xf32>,
    %c0_64 = arith.constant 0 : index
    %c0_65 = arith.constant 0 : index
    %c0_66 = arith.constant 0 : index
    %65 = vector.load %arg4[%c0_64, %c0_65, %c0_66] : memref<1x128x128xf32, #tpu.memory_space<vmem>>, vector<1x128x128xf32>
    %66 = vector.shape_cast %65 : vector<1x128x128xf32> to vector<128x128xf32>
    %cst_67 = arith.constant dense<0.000000e+00> : vector<8x128xf32>
    %67 = tpu.matmul %61, %66, %cst_67 {dimension_numbers = #tpu.dot_dimension_numbers<[1], [0], [0], [1], [0, 0, 1, 1], [], []>} : vector<8x128xf32>, vector<128x128xf32>, vector<8x128xf32> -> vector<8x128xf32>
    %68 = arith.addf %67, %55 : vector<8x128xf32>
    %69 = arith.addf %68, %16 : vector<8x128xf32>
    %cst_68 = arith.constant 0.000000e+00 : f32
    %70 = vector.broadcast %cst_68 : f32 to vector<8x128xf32>
    %71 = arith.maximumf %69, %70 : vector<8x128xf32>
    %c1_69 = arith.constant 1 : index
    %c0_70 = arith.constant 0 : index
    %c0_71 = arith.constant 0 : index
    %72 = vector.load %arg10[%c1_69, %c0_70, %c0_71] : memref<2x8x128xf32, #tpu.memory_space<vmem>>, vector<1x8x128xf32>
    %73 = vector.shape_cast %72 : vector<1x8x128xf32> to vector<8x128xf32>
    %74 = vector.shape_cast %71 : vector<8x128xf32> to vector<1x8x128xf32>
    tpu.vector_store %arg10[%c1_69, %c0_70, %c0_71], %74 {strides = array<i32>} : memref<2x8x128xf32, #tpu.memory_space<vmem>>, vector<1x8x128xf32>,
    %c2_i32 = arith.constant 2 : i32
    %c0_72 = arith.constant 0 : index
    %c0_73 = arith.constant 0 : index
    %c0_74 = arith.constant 0 : index
    %75 = vector.load %arg10[%c0_72, %c0_73, %c0_74] : memref<2x8x128xf32, #tpu.memory_space<vmem>>, vector<1x8x128xf32>
    %76 = vector.shape_cast %75 : vector<1x8x128xf32> to vector<8x128xf32>
    %c0_75 = arith.constant 0 : index
    %c0_76 = arith.constant 0 : index
    %c0_77 = arith.constant 0 : index
    %77 = vector.load %arg3[%c0_75, %c0_76, %c0_77] : memref<2x128x128xf32, #tpu.memory_space<vmem>>, vector<1x128x128xf32>
    %78 = vector.shape_cast %77 : vector<1x128x128xf32> to vector<128x128xf32>
    %cst_78 = arith.constant dense<0.000000e+00> : vector<8x128xf32>
    %79 = tpu.matmul %76, %78, %cst_78 {dimension_numbers = #tpu.dot_dimension_numbers<[1], [0], [0], [1], [0, 0, 1, 1], [], []>} : vector<8x128xf32>, vector<128x128xf32>, vector<8x128xf32> -> vector<8x128xf32>
    %c1_79 = arith.constant 1 : index
    %c0_80 = arith.constant 0 : index
    %c0_81 = arith.constant 0 : index
    %80 = vector.load %arg10[%c1_79, %c0_80, %c0_81] : memref<2x8x128xf32, #tpu.memory_space<vmem>>, vector<1x8x128xf32>
    %81 = vector.shape_cast %80 : vector<1x8x128xf32> to vector<8x128xf32>
    %c1_82 = arith.constant 1 : index
    %c0_83 = arith.constant 0 : index
    %c0_84 = arith.constant 0 : index
    %82 = vector.load %arg3[%c1_82, %c0_83, %c0_84] : memref<2x128x128xf32, #tpu.memory_space<vmem>>, vector<1x128x128xf32>
    %83 = vector.shape_cast %82 : vector<1x128x128xf32> to vector<128x128xf32>
    %cst_85 = arith.constant dense<0.000000e+00> : vector<8x128xf32>
    %84 = tpu.matmul %81, %83, %cst_85 {dimension_numbers = #tpu.dot_dimension_numbers<[1], [0], [0], [1], [0, 0, 1, 1], [], []>} : vector<8x128xf32>, vector<128x128xf32>, vector<8x128xf32> -> vector<8x128xf32>
    %85 = arith.index_cast %c2_i32 : i32 to index
    %c0_86 = arith.constant 0 : index
    %c0_87 = arith.constant 0 : index
    %86 = vector.load %arg9[%85, %c0_86, %c0_87] : memref<8x8x128xf32, #tpu.memory_space<vmem>>, vector<1x8x128xf32>
    %87 = vector.shape_cast %86 : vector<1x8x128xf32> to vector<8x128xf32>
    %88 = arith.addf %87, %79 : vector<8x128xf32>
    %cst_88 = arith.constant 0.000000e+00 : f32
    %89 = vector.broadcast %cst_88 : f32 to vector<8x128xf32>
    %90 = arith.maximumf %88, %89 : vector<8x128xf32>
    %c0_89 = arith.constant 0 : index
    %c0_90 = arith.constant 0 : index
    %c0_91 = arith.constant 0 : index
    %91 = vector.load %arg10[%c0_89, %c0_90, %c0_91] : memref<2x8x128xf32, #tpu.memory_space<vmem>>, vector<1x8x128xf32>
    %92 = vector.shape_cast %91 : vector<1x8x128xf32> to vector<8x128xf32>
    %93 = vector.shape_cast %90 : vector<8x128xf32> to vector<1x8x128xf32>
    tpu.vector_store %arg10[%c0_89, %c0_90, %c0_91], %93 {strides = array<i32>} : memref<2x8x128xf32, #tpu.memory_space<vmem>>, vector<1x8x128xf32>,
    %c0_92 = arith.constant 0 : index
    %c0_93 = arith.constant 0 : index
    %c0_94 = arith.constant 0 : index
    %94 = vector.load %arg4[%c0_92, %c0_93, %c0_94] : memref<1x128x128xf32, #tpu.memory_space<vmem>>, vector<1x128x128xf32>
    %95 = vector.shape_cast %94 : vector<1x128x128xf32> to vector<128x128xf32>
    %cst_95 = arith.constant dense<0.000000e+00> : vector<8x128xf32>
    %96 = tpu.matmul %90, %95, %cst_95 {dimension_numbers = #tpu.dot_dimension_numbers<[1], [0], [0], [1], [0, 0, 1, 1], [], []>} : vector<8x128xf32>, vector<128x128xf32>, vector<8x128xf32> -> vector<8x128xf32>
    %97 = arith.addf %96, %84 : vector<8x128xf32>
    %98 = arith.addf %97, %16 : vector<8x128xf32>
    %cst_96 = arith.constant 0.000000e+00 : f32
    %99 = vector.broadcast %cst_96 : f32 to vector<8x128xf32>
    %100 = arith.maximumf %98, %99 : vector<8x128xf32>
    %c1_97 = arith.constant 1 : index
    %c0_98 = arith.constant 0 : index
    %c0_99 = arith.constant 0 : index
    %101 = vector.load %arg10[%c1_97, %c0_98, %c0_99] : memref<2x8x128xf32, #tpu.memory_space<vmem>>, vector<1x8x128xf32>
    %102 = vector.shape_cast %101 : vector<1x8x128xf32> to vector<8x128xf32>
    %103 = vector.shape_cast %100 : vector<8x128xf32> to vector<1x8x128xf32>
    tpu.vector_store %arg10[%c1_97, %c0_98, %c0_99], %103 {strides = array<i32>} : memref<2x8x128xf32, #tpu.memory_space<vmem>>, vector<1x8x128xf32>,
    %c3_i32 = arith.constant 3 : i32
    %c0_100 = arith.constant 0 : index
    %c0_101 = arith.constant 0 : index
    %c0_102 = arith.constant 0 : index
    %104 = vector.load %arg10[%c0_100, %c0_101, %c0_102] : memref<2x8x128xf32, #tpu.memory_space<vmem>>, vector<1x8x128xf32>
    %105 = vector.shape_cast %104 : vector<1x8x128xf32> to vector<8x128xf32>
    %c0_103 = arith.constant 0 : index
    %c0_104 = arith.constant 0 : index
    %c0_105 = arith.constant 0 : index
    %106 = vector.load %arg3[%c0_103, %c0_104, %c0_105] : memref<2x128x128xf32, #tpu.memory_space<vmem>>, vector<1x128x128xf32>
    %107 = vector.shape_cast %106 : vector<1x128x128xf32> to vector<128x128xf32>
    %cst_106 = arith.constant dense<0.000000e+00> : vector<8x128xf32>
    %108 = tpu.matmul %105, %107, %cst_106 {dimension_numbers = #tpu.dot_dimension_numbers<[1], [0], [0], [1], [0, 0, 1, 1], [], []>} : vector<8x128xf32>, vector<128x128xf32>, vector<8x128xf32> -> vector<8x128xf32>
    %c1_107 = arith.constant 1 : index
    %c0_108 = arith.constant 0 : index
    %c0_109 = arith.constant 0 : index
    %109 = vector.load %arg10[%c1_107, %c0_108, %c0_109] : memref<2x8x128xf32, #tpu.memory_space<vmem>>, vector<1x8x128xf32>
    %110 = vector.shape_cast %109 : vector<1x8x128xf32> to vector<8x128xf32>
    %c1_110 = arith.constant 1 : index
    %c0_111 = arith.constant 0 : index
    %c0_112 = arith.constant 0 : index
    %111 = vector.load %arg3[%c1_110, %c0_111, %c0_112] : memref<2x128x128xf32, #tpu.memory_space<vmem>>, vector<1x128x128xf32>
    %112 = vector.shape_cast %111 : vector<1x128x128xf32> to vector<128x128xf32>
    %cst_113 = arith.constant dense<0.000000e+00> : vector<8x128xf32>
    %113 = tpu.matmul %110, %112, %cst_113 {dimension_numbers = #tpu.dot_dimension_numbers<[1], [0], [0], [1], [0, 0, 1, 1], [], []>} : vector<8x128xf32>, vector<128x128xf32>, vector<8x128xf32> -> vector<8x128xf32>
    %114 = arith.index_cast %c3_i32 : i32 to index
    %c0_114 = arith.constant 0 : index
    %c0_115 = arith.constant 0 : index
    %115 = vector.load %arg9[%114, %c0_114, %c0_115] : memref<8x8x128xf32, #tpu.memory_space<vmem>>, vector<1x8x128xf32>
    %116 = vector.shape_cast %115 : vector<1x8x128xf32> to vector<8x128xf32>
    %117 = arith.addf %116, %108 : vector<8x128xf32>
    %cst_116 = arith.constant 0.000000e+00 : f32
    %118 = vector.broadcast %cst_116 : f32 to vector<8x128xf32>
    %119 = arith.maximumf %117, %118 : vector<8x128xf32>
    %c0_117 = arith.constant 0 : index
    %c0_118 = arith.constant 0 : index
    %c0_119 = arith.constant 0 : index
    %120 = vector.load %arg10[%c0_117, %c0_118, %c0_119] : memref<2x8x128xf32, #tpu.memory_space<vmem>>, vector<1x8x128xf32>
    %121 = vector.shape_cast %120 : vector<1x8x128xf32> to vector<8x128xf32>
    %122 = vector.shape_cast %119 : vector<8x128xf32> to vector<1x8x128xf32>
    tpu.vector_store %arg10[%c0_117, %c0_118, %c0_119], %122 {strides = array<i32>} : memref<2x8x128xf32, #tpu.memory_space<vmem>>, vector<1x8x128xf32>,
    %c0_120 = arith.constant 0 : index
    %c0_121 = arith.constant 0 : index
    %c0_122 = arith.constant 0 : index
    %123 = vector.load %arg4[%c0_120, %c0_121, %c0_122] : memref<1x128x128xf32, #tpu.memory_space<vmem>>, vector<1x128x128xf32>
    %124 = vector.shape_cast %123 : vector<1x128x128xf32> to vector<128x128xf32>
    %cst_123 = arith.constant dense<0.000000e+00> : vector<8x128xf32>
    %125 = tpu.matmul %119, %124, %cst_123 {dimension_numbers = #tpu.dot_dimension_numbers<[1], [0], [0], [1], [0, 0, 1, 1], [], []>} : vector<8x128xf32>, vector<128x128xf32>, vector<8x128xf32> -> vector<8x128xf32>
    %126 = arith.addf %125, %113 : vector<8x128xf32>
    %127 = arith.addf %126, %16 : vector<8x128xf32>
    %cst_124 = arith.constant 0.000000e+00 : f32
    %128 = vector.broadcast %cst_124 : f32 to vector<8x128xf32>
    %129 = arith.maximumf %127, %128 : vector<8x128xf32>
    %c1_125 = arith.constant 1 : index
    %c0_126 = arith.constant 0 : index
    %c0_127 = arith.constant 0 : index
    %130 = vector.load %arg10[%c1_125, %c0_126, %c0_127] : memref<2x8x128xf32, #tpu.memory_space<vmem>>, vector<1x8x128xf32>
    %131 = vector.shape_cast %130 : vector<1x8x128xf32> to vector<8x128xf32>
    %132 = vector.shape_cast %129 : vector<8x128xf32> to vector<1x8x128xf32>
    tpu.vector_store %arg10[%c1_125, %c0_126, %c0_127], %132 {strides = array<i32>} : memref<2x8x128xf32, #tpu.memory_space<vmem>>, vector<1x8x128xf32>,
    %c4_i32 = arith.constant 4 : i32
    %c0_128 = arith.constant 0 : index
    %c0_129 = arith.constant 0 : index
    %c0_130 = arith.constant 0 : index
    %133 = vector.load %arg10[%c0_128, %c0_129, %c0_130] : memref<2x8x128xf32, #tpu.memory_space<vmem>>, vector<1x8x128xf32>
    %134 = vector.shape_cast %133 : vector<1x8x128xf32> to vector<8x128xf32>
    %c0_131 = arith.constant 0 : index
    %c0_132 = arith.constant 0 : index
    %c0_133 = arith.constant 0 : index
    %135 = vector.load %arg3[%c0_131, %c0_132, %c0_133] : memref<2x128x128xf32, #tpu.memory_space<vmem>>, vector<1x128x128xf32>
    %136 = vector.shape_cast %135 : vector<1x128x128xf32> to vector<128x128xf32>
    %cst_134 = arith.constant dense<0.000000e+00> : vector<8x128xf32>
    %137 = tpu.matmul %134, %136, %cst_134 {dimension_numbers = #tpu.dot_dimension_numbers<[1], [0], [0], [1], [0, 0, 1, 1], [], []>} : vector<8x128xf32>, vector<128x128xf32>, vector<8x128xf32> -> vector<8x128xf32>
    %c1_135 = arith.constant 1 : index
    %c0_136 = arith.constant 0 : index
    %c0_137 = arith.constant 0 : index
    %138 = vector.load %arg10[%c1_135, %c0_136, %c0_137] : memref<2x8x128xf32, #tpu.memory_space<vmem>>, vector<1x8x128xf32>
    %139 = vector.shape_cast %138 : vector<1x8x128xf32> to vector<8x128xf32>
    %c1_138 = arith.constant 1 : index
    %c0_139 = arith.constant 0 : index
    %c0_140 = arith.constant 0 : index
    %140 = vector.load %arg3[%c1_138, %c0_139, %c0_140] : memref<2x128x128xf32, #tpu.memory_space<vmem>>, vector<1x128x128xf32>
    %141 = vector.shape_cast %140 : vector<1x128x128xf32> to vector<128x128xf32>
    %cst_141 = arith.constant dense<0.000000e+00> : vector<8x128xf32>
    %142 = tpu.matmul %139, %141, %cst_141 {dimension_numbers = #tpu.dot_dimension_numbers<[1], [0], [0], [1], [0, 0, 1, 1], [], []>} : vector<8x128xf32>, vector<128x128xf32>, vector<8x128xf32> -> vector<8x128xf32>
    %143 = arith.index_cast %c4_i32 : i32 to index
    %c0_142 = arith.constant 0 : index
    %c0_143 = arith.constant 0 : index
    %144 = vector.load %arg9[%143, %c0_142, %c0_143] : memref<8x8x128xf32, #tpu.memory_space<vmem>>, vector<1x8x128xf32>
    %145 = vector.shape_cast %144 : vector<1x8x128xf32> to vector<8x128xf32>
    %146 = arith.addf %145, %137 : vector<8x128xf32>
    %cst_144 = arith.constant 0.000000e+00 : f32
    %147 = vector.broadcast %cst_144 : f32 to vector<8x128xf32>
    %148 = arith.maximumf %146, %147 : vector<8x128xf32>
    %c0_145 = arith.constant 0 : index
    %c0_146 = arith.constant 0 : index
    %c0_147 = arith.constant 0 : index
    %149 = vector.load %arg10[%c0_145, %c0_146, %c0_147] : memref<2x8x128xf32, #tpu.memory_space<vmem>>, vector<1x8x128xf32>
    %150 = vector.shape_cast %149 : vector<1x8x128xf32> to vector<8x128xf32>
    %151 = vector.shape_cast %148 : vector<8x128xf32> to vector<1x8x128xf32>
    tpu.vector_store %arg10[%c0_145, %c0_146, %c0_147], %151 {strides = array<i32>} : memref<2x8x128xf32, #tpu.memory_space<vmem>>, vector<1x8x128xf32>,
    %c0_148 = arith.constant 0 : index
    %c0_149 = arith.constant 0 : index
    %c0_150 = arith.constant 0 : index
    %152 = vector.load %arg4[%c0_148, %c0_149, %c0_150] : memref<1x128x128xf32, #tpu.memory_space<vmem>>, vector<1x128x128xf32>
    %153 = vector.shape_cast %152 : vector<1x128x128xf32> to vector<128x128xf32>
    %cst_151 = arith.constant dense<0.000000e+00> : vector<8x128xf32>
    %154 = tpu.matmul %148, %153, %cst_151 {dimension_numbers = #tpu.dot_dimension_numbers<[1], [0], [0], [1], [0, 0, 1, 1], [], []>} : vector<8x128xf32>, vector<128x128xf32>, vector<8x128xf32> -> vector<8x128xf32>
    %155 = arith.addf %154, %142 : vector<8x128xf32>
    %156 = arith.addf %155, %16 : vector<8x128xf32>
    %cst_152 = arith.constant 0.000000e+00 : f32
    %157 = vector.broadcast %cst_152 : f32 to vector<8x128xf32>
    %158 = arith.maximumf %156, %157 : vector<8x128xf32>
    %c1_153 = arith.constant 1 : index
    %c0_154 = arith.constant 0 : index
    %c0_155 = arith.constant 0 : index
    %159 = vector.load %arg10[%c1_153, %c0_154, %c0_155] : memref<2x8x128xf32, #tpu.memory_space<vmem>>, vector<1x8x128xf32>
    %160 = vector.shape_cast %159 : vector<1x8x128xf32> to vector<8x128xf32>
    %161 = vector.shape_cast %158 : vector<8x128xf32> to vector<1x8x128xf32>
    tpu.vector_store %arg10[%c1_153, %c0_154, %c0_155], %161 {strides = array<i32>} : memref<2x8x128xf32, #tpu.memory_space<vmem>>, vector<1x8x128xf32>,
    %c5_i32 = arith.constant 5 : i32
    %c0_156 = arith.constant 0 : index
    %c0_157 = arith.constant 0 : index
    %c0_158 = arith.constant 0 : index
    %162 = vector.load %arg10[%c0_156, %c0_157, %c0_158] : memref<2x8x128xf32, #tpu.memory_space<vmem>>, vector<1x8x128xf32>
    %163 = vector.shape_cast %162 : vector<1x8x128xf32> to vector<8x128xf32>
    %c0_159 = arith.constant 0 : index
    %c0_160 = arith.constant 0 : index
    %c0_161 = arith.constant 0 : index
    %164 = vector.load %arg3[%c0_159, %c0_160, %c0_161] : memref<2x128x128xf32, #tpu.memory_space<vmem>>, vector<1x128x128xf32>
    %165 = vector.shape_cast %164 : vector<1x128x128xf32> to vector<128x128xf32>
    %cst_162 = arith.constant dense<0.000000e+00> : vector<8x128xf32>
    %166 = tpu.matmul %163, %165, %cst_162 {dimension_numbers = #tpu.dot_dimension_numbers<[1], [0], [0], [1], [0, 0, 1, 1], [], []>} : vector<8x128xf32>, vector<128x128xf32>, vector<8x128xf32> -> vector<8x128xf32>
    %c1_163 = arith.constant 1 : index
    %c0_164 = arith.constant 0 : index
    %c0_165 = arith.constant 0 : index
    %167 = vector.load %arg10[%c1_163, %c0_164, %c0_165] : memref<2x8x128xf32, #tpu.memory_space<vmem>>, vector<1x8x128xf32>
    %168 = vector.shape_cast %167 : vector<1x8x128xf32> to vector<8x128xf32>
    %c1_166 = arith.constant 1 : index
    %c0_167 = arith.constant 0 : index
    %c0_168 = arith.constant 0 : index
    %169 = vector.load %arg3[%c1_166, %c0_167, %c0_168] : memref<2x128x128xf32, #tpu.memory_space<vmem>>, vector<1x128x128xf32>
    %170 = vector.shape_cast %169 : vector<1x128x128xf32> to vector<128x128xf32>
    %cst_169 = arith.constant dense<0.000000e+00> : vector<8x128xf32>
    %171 = tpu.matmul %168, %170, %cst_169 {dimension_numbers = #tpu.dot_dimension_numbers<[1], [0], [0], [1], [0, 0, 1, 1], [], []>} : vector<8x128xf32>, vector<128x128xf32>, vector<8x128xf32> -> vector<8x128xf32>
    %172 = arith.index_cast %c5_i32 : i32 to index
    %c0_170 = arith.constant 0 : index
    %c0_171 = arith.constant 0 : index
    %173 = vector.load %arg9[%172, %c0_170, %c0_171] : memref<8x8x128xf32, #tpu.memory_space<vmem>>, vector<1x8x128xf32>
    %174 = vector.shape_cast %173 : vector<1x8x128xf32> to vector<8x128xf32>
    %175 = arith.addf %174, %166 : vector<8x128xf32>
    %cst_172 = arith.constant 0.000000e+00 : f32
    %176 = vector.broadcast %cst_172 : f32 to vector<8x128xf32>
    %177 = arith.maximumf %175, %176 : vector<8x128xf32>
    %c0_173 = arith.constant 0 : index
    %c0_174 = arith.constant 0 : index
    %c0_175 = arith.constant 0 : index
    %178 = vector.load %arg10[%c0_173, %c0_174, %c0_175] : memref<2x8x128xf32, #tpu.memory_space<vmem>>, vector<1x8x128xf32>
    %179 = vector.shape_cast %178 : vector<1x8x128xf32> to vector<8x128xf32>
    %180 = vector.shape_cast %177 : vector<8x128xf32> to vector<1x8x128xf32>
    tpu.vector_store %arg10[%c0_173, %c0_174, %c0_175], %180 {strides = array<i32>} : memref<2x8x128xf32, #tpu.memory_space<vmem>>, vector<1x8x128xf32>,
    %c0_176 = arith.constant 0 : index
    %c0_177 = arith.constant 0 : index
    %c0_178 = arith.constant 0 : index
    %181 = vector.load %arg4[%c0_176, %c0_177, %c0_178] : memref<1x128x128xf32, #tpu.memory_space<vmem>>, vector<1x128x128xf32>
    %182 = vector.shape_cast %181 : vector<1x128x128xf32> to vector<128x128xf32>
    %cst_179 = arith.constant dense<0.000000e+00> : vector<8x128xf32>
    %183 = tpu.matmul %177, %182, %cst_179 {dimension_numbers = #tpu.dot_dimension_numbers<[1], [0], [0], [1], [0, 0, 1, 1], [], []>} : vector<8x128xf32>, vector<128x128xf32>, vector<8x128xf32> -> vector<8x128xf32>
    %184 = arith.addf %183, %171 : vector<8x128xf32>
    %185 = arith.addf %184, %16 : vector<8x128xf32>
    %cst_180 = arith.constant 0.000000e+00 : f32
    %186 = vector.broadcast %cst_180 : f32 to vector<8x128xf32>
    %187 = arith.maximumf %185, %186 : vector<8x128xf32>
    %c1_181 = arith.constant 1 : index
    %c0_182 = arith.constant 0 : index
    %c0_183 = arith.constant 0 : index
    %188 = vector.load %arg10[%c1_181, %c0_182, %c0_183] : memref<2x8x128xf32, #tpu.memory_space<vmem>>, vector<1x8x128xf32>
    %189 = vector.shape_cast %188 : vector<1x8x128xf32> to vector<8x128xf32>
    %190 = vector.shape_cast %187 : vector<8x128xf32> to vector<1x8x128xf32>
    tpu.vector_store %arg10[%c1_181, %c0_182, %c0_183], %190 {strides = array<i32>} : memref<2x8x128xf32, #tpu.memory_space<vmem>>, vector<1x8x128xf32>,
    %c6_i32 = arith.constant 6 : i32
    %c0_184 = arith.constant 0 : index
    %c0_185 = arith.constant 0 : index
    %c0_186 = arith.constant 0 : index
    %191 = vector.load %arg10[%c0_184, %c0_185, %c0_186] : memref<2x8x128xf32, #tpu.memory_space<vmem>>, vector<1x8x128xf32>
    %192 = vector.shape_cast %191 : vector<1x8x128xf32> to vector<8x128xf32>
    %c0_187 = arith.constant 0 : index
    %c0_188 = arith.constant 0 : index
    %c0_189 = arith.constant 0 : index
    %193 = vector.load %arg3[%c0_187, %c0_188, %c0_189] : memref<2x128x128xf32, #tpu.memory_space<vmem>>, vector<1x128x128xf32>
    %194 = vector.shape_cast %193 : vector<1x128x128xf32> to vector<128x128xf32>
    %cst_190 = arith.constant dense<0.000000e+00> : vector<8x128xf32>
    %195 = tpu.matmul %192, %194, %cst_190 {dimension_numbers = #tpu.dot_dimension_numbers<[1], [0], [0], [1], [0, 0, 1, 1], [], []>} : vector<8x128xf32>, vector<128x128xf32>, vector<8x128xf32> -> vector<8x128xf32>
    %c1_191 = arith.constant 1 : index
    %c0_192 = arith.constant 0 : index
    %c0_193 = arith.constant 0 : index
    %196 = vector.load %arg10[%c1_191, %c0_192, %c0_193] : memref<2x8x128xf32, #tpu.memory_space<vmem>>, vector<1x8x128xf32>
    %197 = vector.shape_cast %196 : vector<1x8x128xf32> to vector<8x128xf32>
    %c1_194 = arith.constant 1 : index
    %c0_195 = arith.constant 0 : index
    %c0_196 = arith.constant 0 : index
    %198 = vector.load %arg3[%c1_194, %c0_195, %c0_196] : memref<2x128x128xf32, #tpu.memory_space<vmem>>, vector<1x128x128xf32>
    %199 = vector.shape_cast %198 : vector<1x128x128xf32> to vector<128x128xf32>
    %cst_197 = arith.constant dense<0.000000e+00> : vector<8x128xf32>
    %200 = tpu.matmul %197, %199, %cst_197 {dimension_numbers = #tpu.dot_dimension_numbers<[1], [0], [0], [1], [0, 0, 1, 1], [], []>} : vector<8x128xf32>, vector<128x128xf32>, vector<8x128xf32> -> vector<8x128xf32>
    %201 = arith.index_cast %c6_i32 : i32 to index
    %c0_198 = arith.constant 0 : index
    %c0_199 = arith.constant 0 : index
    %202 = vector.load %arg9[%201, %c0_198, %c0_199] : memref<8x8x128xf32, #tpu.memory_space<vmem>>, vector<1x8x128xf32>
    %203 = vector.shape_cast %202 : vector<1x8x128xf32> to vector<8x128xf32>
    %204 = arith.addf %203, %195 : vector<8x128xf32>
    %cst_200 = arith.constant 0.000000e+00 : f32
    %205 = vector.broadcast %cst_200 : f32 to vector<8x128xf32>
    %206 = arith.maximumf %204, %205 : vector<8x128xf32>
    %c0_201 = arith.constant 0 : index
    %c0_202 = arith.constant 0 : index
    %c0_203 = arith.constant 0 : index
    %207 = vector.load %arg10[%c0_201, %c0_202, %c0_203] : memref<2x8x128xf32, #tpu.memory_space<vmem>>, vector<1x8x128xf32>
    %208 = vector.shape_cast %207 : vector<1x8x128xf32> to vector<8x128xf32>
    %209 = vector.shape_cast %206 : vector<8x128xf32> to vector<1x8x128xf32>
    tpu.vector_store %arg10[%c0_201, %c0_202, %c0_203], %209 {strides = array<i32>} : memref<2x8x128xf32, #tpu.memory_space<vmem>>, vector<1x8x128xf32>,
    %c0_204 = arith.constant 0 : index
    %c0_205 = arith.constant 0 : index
    %c0_206 = arith.constant 0 : index
    %210 = vector.load %arg4[%c0_204, %c0_205, %c0_206] : memref<1x128x128xf32, #tpu.memory_space<vmem>>, vector<1x128x128xf32>
    %211 = vector.shape_cast %210 : vector<1x128x128xf32> to vector<128x128xf32>
    %cst_207 = arith.constant dense<0.000000e+00> : vector<8x128xf32>
    %212 = tpu.matmul %206, %211, %cst_207 {dimension_numbers = #tpu.dot_dimension_numbers<[1], [0], [0], [1], [0, 0, 1, 1], [], []>} : vector<8x128xf32>, vector<128x128xf32>, vector<8x128xf32> -> vector<8x128xf32>
    %213 = arith.addf %212, %200 : vector<8x128xf32>
    %214 = arith.addf %213, %16 : vector<8x128xf32>
    %cst_208 = arith.constant 0.000000e+00 : f32
    %215 = vector.broadcast %cst_208 : f32 to vector<8x128xf32>
    %216 = arith.maximumf %214, %215 : vector<8x128xf32>
    %c1_209 = arith.constant 1 : index
    %c0_210 = arith.constant 0 : index
    %c0_211 = arith.constant 0 : index
    %217 = vector.load %arg10[%c1_209, %c0_210, %c0_211] : memref<2x8x128xf32, #tpu.memory_space<vmem>>, vector<1x8x128xf32>
    %218 = vector.shape_cast %217 : vector<1x8x128xf32> to vector<8x128xf32>
    %219 = vector.shape_cast %216 : vector<8x128xf32> to vector<1x8x128xf32>
    tpu.vector_store %arg10[%c1_209, %c0_210, %c0_211], %219 {strides = array<i32>} : memref<2x8x128xf32, #tpu.memory_space<vmem>>, vector<1x8x128xf32>,
    %c7_i32 = arith.constant 7 : i32
    %c0_212 = arith.constant 0 : index
    %c0_213 = arith.constant 0 : index
    %c0_214 = arith.constant 0 : index
    %220 = vector.load %arg10[%c0_212, %c0_213, %c0_214] : memref<2x8x128xf32, #tpu.memory_space<vmem>>, vector<1x8x128xf32>
    %221 = vector.shape_cast %220 : vector<1x8x128xf32> to vector<8x128xf32>
    %c0_215 = arith.constant 0 : index
    %c0_216 = arith.constant 0 : index
    %c0_217 = arith.constant 0 : index
    %222 = vector.load %arg3[%c0_215, %c0_216, %c0_217] : memref<2x128x128xf32, #tpu.memory_space<vmem>>, vector<1x128x128xf32>
    %223 = vector.shape_cast %222 : vector<1x128x128xf32> to vector<128x128xf32>
    %cst_218 = arith.constant dense<0.000000e+00> : vector<8x128xf32>
    %224 = tpu.matmul %221, %223, %cst_218 {dimension_numbers = #tpu.dot_dimension_numbers<[1], [0], [0], [1], [0, 0, 1, 1], [], []>} : vector<8x128xf32>, vector<128x128xf32>, vector<8x128xf32> -> vector<8x128xf32>
    %c1_219 = arith.constant 1 : index
    %c0_220 = arith.constant 0 : index
    %c0_221 = arith.constant 0 : index
    %225 = vector.load %arg10[%c1_219, %c0_220, %c0_221] : memref<2x8x128xf32, #tpu.memory_space<vmem>>, vector<1x8x128xf32>
    %226 = vector.shape_cast %225 : vector<1x8x128xf32> to vector<8x128xf32>
    %c1_222 = arith.constant 1 : index
    %c0_223 = arith.constant 0 : index
    %c0_224 = arith.constant 0 : index
    %227 = vector.load %arg3[%c1_222, %c0_223, %c0_224] : memref<2x128x128xf32, #tpu.memory_space<vmem>>, vector<1x128x128xf32>
    %228 = vector.shape_cast %227 : vector<1x128x128xf32> to vector<128x128xf32>
    %cst_225 = arith.constant dense<0.000000e+00> : vector<8x128xf32>
    %229 = tpu.matmul %226, %228, %cst_225 {dimension_numbers = #tpu.dot_dimension_numbers<[1], [0], [0], [1], [0, 0, 1, 1], [], []>} : vector<8x128xf32>, vector<128x128xf32>, vector<8x128xf32> -> vector<8x128xf32>
    %230 = arith.index_cast %c7_i32 : i32 to index
    %c0_226 = arith.constant 0 : index
    %c0_227 = arith.constant 0 : index
    %231 = vector.load %arg9[%230, %c0_226, %c0_227] : memref<8x8x128xf32, #tpu.memory_space<vmem>>, vector<1x8x128xf32>
    %232 = vector.shape_cast %231 : vector<1x8x128xf32> to vector<8x128xf32>
    %233 = arith.addf %232, %224 : vector<8x128xf32>
    %cst_228 = arith.constant 0.000000e+00 : f32
    %234 = vector.broadcast %cst_228 : f32 to vector<8x128xf32>
    %235 = arith.maximumf %233, %234 : vector<8x128xf32>
    %c0_229 = arith.constant 0 : index
    %c0_230 = arith.constant 0 : index
    %c0_231 = arith.constant 0 : index
    %236 = vector.load %arg10[%c0_229, %c0_230, %c0_231] : memref<2x8x128xf32, #tpu.memory_space<vmem>>, vector<1x8x128xf32>
    %237 = vector.shape_cast %236 : vector<1x8x128xf32> to vector<8x128xf32>
    %238 = vector.shape_cast %235 : vector<8x128xf32> to vector<1x8x128xf32>
    tpu.vector_store %arg10[%c0_229, %c0_230, %c0_231], %238 {strides = array<i32>} : memref<2x8x128xf32, #tpu.memory_space<vmem>>, vector<1x8x128xf32>,
    %c0_232 = arith.constant 0 : index
    %c0_233 = arith.constant 0 : index
    %c0_234 = arith.constant 0 : index
    %239 = vector.load %arg4[%c0_232, %c0_233, %c0_234] : memref<1x128x128xf32, #tpu.memory_space<vmem>>, vector<1x128x128xf32>
    %240 = vector.shape_cast %239 : vector<1x128x128xf32> to vector<128x128xf32>
    %cst_235 = arith.constant dense<0.000000e+00> : vector<8x128xf32>
    %241 = tpu.matmul %235, %240, %cst_235 {dimension_numbers = #tpu.dot_dimension_numbers<[1], [0], [0], [1], [0, 0, 1, 1], [], []>} : vector<8x128xf32>, vector<128x128xf32>, vector<8x128xf32> -> vector<8x128xf32>
    %242 = arith.addf %241, %229 : vector<8x128xf32>
    %243 = arith.addf %242, %16 : vector<8x128xf32>
    %cst_236 = arith.constant 0.000000e+00 : f32
    %244 = vector.broadcast %cst_236 : f32 to vector<8x128xf32>
    %245 = arith.maximumf %243, %244 : vector<8x128xf32>
    %c1_237 = arith.constant 1 : index
    %c0_238 = arith.constant 0 : index
    %c0_239 = arith.constant 0 : index
    %246 = vector.load %arg10[%c1_237, %c0_238, %c0_239] : memref<2x8x128xf32, #tpu.memory_space<vmem>>, vector<1x8x128xf32>
    %247 = vector.shape_cast %246 : vector<1x8x128xf32> to vector<8x128xf32>
    %248 = vector.shape_cast %245 : vector<8x128xf32> to vector<1x8x128xf32>
    tpu.vector_store %arg10[%c1_237, %c0_238, %c0_239], %248 {strides = array<i32>} : memref<2x8x128xf32, #tpu.memory_space<vmem>>, vector<1x8x128xf32>,
    %c8_i32 = arith.constant 8 : i32
    %c1_240 = arith.constant 1 : index
    %c0_241 = arith.constant 0 : index
    %c0_242 = arith.constant 0 : index
    %249 = vector.load %arg10[%c1_240, %c0_241, %c0_242] : memref<2x8x128xf32, #tpu.memory_space<vmem>>, vector<1x8x128xf32>
    %250 = vector.shape_cast %249 : vector<1x8x128xf32> to vector<8x128xf32>
    %c0_243 = arith.constant 0 : index
    %c0_244 = arith.constant 0 : index
    %251 = vector.load %arg6[%c0_243, %c0_244] : memref<128x128xf32, #tpu.memory_space<vmem>>, vector<128x128xf32>
    %cst_245 = arith.constant dense<0.000000e+00> : vector<8x128xf32>
    %252 = tpu.matmul %250, %251, %cst_245 {dimension_numbers = #tpu.dot_dimension_numbers<[1], [0], [0], [1], [0, 0, 1, 1], [], []>} : vector<8x128xf32>, vector<128x128xf32>, vector<8x128xf32> -> vector<8x128xf32>
    %c0_246 = arith.constant 0 : index
    %c0_247 = arith.constant 0 : index
    %253 = vector.load %arg7[%c0_246, %c0_247] : memref<1x128xf32, #tpu.memory_space<vmem>>, vector<1x128xf32>
    %254 = vector.broadcast %253 : vector<1x128xf32> to vector<8x128xf32>
    %255 = arith.addf %252, %254 : vector<8x128xf32>
    %c0_248 = arith.constant 0 : index
    %c0_249 = arith.constant 0 : index
    %256 = vector.load %arg8[%c0_248, %c0_249] : memref<8x128xf32, #tpu.memory_space<vmem>>, vector<8x128xf32>
    tpu.vector_store %arg8[%c0_248, %c0_249], %255 {strides = array<i32>} : memref<8x128xf32, #tpu.memory_space<vmem>>, vector<8x128xf32>,
    return
  }
  func.func @transform_0(%arg0: i32) -> (i32, i32, i32) {
    %c0_i32 = arith.constant 0 : i32
    %c0_i32_0 = arith.constant 0 : i32
    %c0_i32_1 = arith.constant 0 : i32
    return %c0_i32, %arg0, %c0_i32_0 : i32, i32, i32
  }
  func.func @transform_1(%arg0: i32) -> (i32, i32) {
    %c0_i32 = arith.constant 0 : i32
    %c0_i32_0 = arith.constant 0 : i32
    %c0_i32_1 = arith.constant 0 : i32
    return %c0_i32, %c0_i32_0 : i32, i32
  }
  func.func @transform_2(%arg0: i32) -> (i32, i32, i32) {
    %c0_i32 = arith.constant 0 : i32
    %c0_i32_0 = arith.constant 0 : i32
    %c0_i32_1 = arith.constant 0 : i32
    %c0_i32_2 = arith.constant 0 : i32
    return %c0_i32, %c0_i32_0, %c0_i32_1 : i32, i32, i32
  }
  func.func @transform_3(%arg0: i32) -> (i32, i32, i32) {
    %c0_i32 = arith.constant 0 : i32
    %c0_i32_0 = arith.constant 0 : i32
    %c0_i32_1 = arith.constant 0 : i32
    %c0_i32_2 = arith.constant 0 : i32
    return %c0_i32, %c0_i32_0, %c0_i32_1 : i32, i32, i32
  }
  func.func @transform_4(%arg0: i32) -> (i32, i32, i32) {
    %c0_i32 = arith.constant 0 : i32
    %c0_i32_0 = arith.constant 0 : i32
    %c0_i32_1 = arith.constant 0 : i32
    %c0_i32_2 = arith.constant 0 : i32
    return %c0_i32, %c0_i32_0, %c0_i32_1 : i32, i32, i32
  }
  func.func @transform_5(%arg0: i32) -> (i32, i32) {
    %c0_i32 = arith.constant 0 : i32
    %c0_i32_0 = arith.constant 0 : i32
    %c0_i32_1 = arith.constant 0 : i32
    return %c0_i32, %c0_i32_0 : i32, i32
  }
  func.func @transform_6(%arg0: i32) -> (i32, i32) {
    %c0_i32 = arith.constant 0 : i32
    %c0_i32_0 = arith.constant 0 : i32
    %c0_i32_1 = arith.constant 0 : i32
    return %c0_i32, %c0_i32_0 : i32, i32
  }
  func.func @transform_7(%arg0: i32) -> (i32, i32) {
    %c0_i32 = arith.constant 0 : i32
    %c0_i32_0 = arith.constant 0 : i32
    return %arg0, %c0_i32 : i32, i32
  }
}

</mosaic_0001>

<bundles_post_ra>
// kernel: rnn_model_forward.1
= control target key start
LH: loop header
LB: loop body
LE: loop exit
PB: predicated region body
PF: predicated region fallthrough
CT: control target
= control target key end

     0   :  { %v1242_v55 = vmov 0.0   ;;  %s2233_s1 = inlined_call_operand.vmem [shape: f32[128,128], index: 1, kind: input, shape index: {}]   ;;  %s2234_s2 = inlined_call_operand.vmem [shape: f32[2,128,128], index: 2, kind: input, shape index: {}]   ;;  %s2235_s3 = inlined_call_operand.vmem [shape: f32[1,128,128], index: 3, kind: input, shape index: {}]   ;;  %s2236_s4 = inlined_call_operand.vmem [shape: f32[2,1,128], index: 4, kind: input, shape index: {}]   ;;  %s2237_s0 = inlined_call_operand.vmem [shape: f32[8,8,128], index: 0, kind: input, shape index: {}]   ;;  %s2238_s5 = inlined_call_operand.vmem [shape: f32[128,128], index: 5, kind: input, shape index: {}]   ;;  %s2239_s6 = inlined_call_operand.vmem [shape: f32[1,128], index: 6, kind: input, shape index: {}]   ;;  %s2240_s7 = inlined_call_operand.vmem [shape: f32[8,128], index: 7, kind: output, shape index: {}]  }
   0x1   :  { %v49_v0 = vld [vmem:[%s2233_s1 + $0x78] sm:$0xff]  ;;  %v48_v1 = vld [vmem:[%s2233_s1 + $0x70] sm:$0xff]  ;;  %v47_v4 = vld [vmem:[%s2233_s1 + $0x68] sm:$0xff] }
   0x2   :  { %v1292_v2 = vld [vmem:[%s2234_s2 + $0x78] sm:$0xff]  ;;  %50 = vmatpush.msra.mxu0 %v49_v0  ;;  %v1298_v3 = vld [vmem:[%s2234_s2 + $0x70] sm:$0xff]  ;;  %v1306_v5 = vld [vmem:[%s2234_s2 + $0x68] sm:$0xff] }
   0x3   :  { %135 = vmatpush.msra.mxu1 %v1292_v2  ;;  %v46_v6 = vld [vmem:[%s2233_s1 + $0x60] sm:$0xff]  ;;  %v45_v8 = vld [vmem:[%s2233_s1 + $0x58] sm:$0xff]  ;;  %v44_v10 = vld [vmem:[%s2233_s1 + $0x50] sm:$0xff] }
   0x4   :  { %51 = vmatpush.msra.mxu0 %v48_v1  ;;  %v1315_v7 = vld [vmem:[%s2234_s2 + $0x60] sm:$0xff]  ;;  %v1324_v9 = vld [vmem:[%s2234_s2 + $0x58] sm:$0xff]  ;;  %v1333_v11 = vld [vmem:[%s2234_s2 + $0x50] sm:$0xff] }
   0x5   :  { %136 = vmatpush.msra.mxu1 %v1298_v3  ;;  %v43_v12 = vld [vmem:[%s2233_s1 + $0x48] sm:$0xff]  ;;  %v1348_v14 = vld [vmem:[%s2234_s2 + $0xf8] sm:$0xff]  ;;  %v1358_v16 = vld [vmem:[%s2234_s2 + $0xf0] sm:$0xff] }
   0x6   :  { %52 = vmatpush.msra.mxu0 %v47_v4  ;;  %v1342_v13 = vld [vmem:[%s2234_s2 + $0x48] sm:$0xff]  ;;  %v1353_v15 = vld [vmem:[%s2235_s3 + $0x78] sm:$0xff]  ;;  %v42_v17 = vld [vmem:[%s2233_s1 + $0x40] sm:$0xff]  ;;  %174 = vmatpush.msra.mxu2 %v1348_v14 }
   0x7   :  { %137 = vmatpush.msra.mxu1 %v1306_v5  ;;  %v1366_v18 = vld [vmem:[%s2234_s2 + $0x40] sm:$0xff]  ;;  %214 = vmatpush.msra.mxu3 %v1353_v15  ;;  %v1373_v19 = vld [vmem:[%s2235_s3 + $0x70] sm:$0xff]  ;;  %v1379_v20 = vld [vmem:[%s2234_s2 + $0xe8] sm:$0xff] }
   0x8   :  { %53 = vmatpush.msra.mxu0 %v46_v6  ;;  %v1384_v21 = vld [vmem:[%s2235_s3 + $0x68] sm:$0xff]  ;;  %v41_v22 = vld [vmem:[%s2233_s1 + $0x38] sm:$0xff]  ;;  %175 = vmatpush.msra.mxu2 %v1358_v16  ;;  %v1400_v24 = vld [vmem:[%s2234_s2 + $0xe0] sm:$0xff] }
   0x9   :  { %138 = vmatpush.msra.mxu1 %v1315_v7  ;;  %v1392_v23 = vld [vmem:[%s2234_s2 + $0x38] sm:$0xff]  ;;  %215 = vmatpush.msra.mxu3 %v1373_v19  ;;  %v1405_v25 = vld [vmem:[%s2235_s3 + $0x60] sm:$0xff]  ;;  %v40_v26 = vld [vmem:[%s2233_s1 + $0x30] sm:$0xff] }
   0xa   :  { %54 = vmatpush.msra.mxu0 %v45_v8  ;;  %v1413_v27 = vld [vmem:[%s2234_s2 + $0x30] sm:$0xff]  ;;  %176 = vmatpush.msra.mxu2 %v1379_v20  ;;  %v1421_v28 = vld [vmem:[%s2234_s2 + $0xd8] sm:$0xff]  ;;  %v39_v30 = vld [vmem:[%s2233_s1 + $0x28] sm:$0xff] }
   0xb   :  { %139 = vmatpush.msra.mxu1 %v1324_v9  ;;  %216 = vmatpush.msra.mxu3 %v1384_v21  ;;  %v1426_v29 = vld [vmem:[%s2235_s3 + $0x58] sm:$0xff]  ;;  %v1434_v31 = vld [vmem:[%s2234_s2 + $0x28] sm:$0xff]  ;;  %v1442_v32 = vld [vmem:[%s2234_s2 + $0xd0] sm:$0xff] }
   0xc   :  { %55 = vmatpush.msra.mxu0 %v44_v10  ;;  %177 = vmatpush.msra.mxu2 %v1400_v24  ;;  %v1447_v33 = vld [vmem:[%s2235_s3 + $0x50] sm:$0xff]  ;;  %v38_v34 = vld [vmem:[%s2233_s1 + $0x20] sm:$0xff]  ;;  %v1463_v36 = vld [vmem:[%s2234_s2 + $0xc8] sm:$0xff] }
   0xd   :  { %140 = vmatpush.msra.mxu1 %v1333_v11  ;;  %217 = vmatpush.msra.mxu3 %v1405_v25  ;;  %v1455_v35 = vld [vmem:[%s2234_s2 + $0x20] sm:$0xff]  ;;  %v1468_v37 = vld [vmem:[%s2235_s3 + $0x48] sm:$0xff]  ;;  %v37_v38 = vld [vmem:[%s2233_s1 + $0x18] sm:$0xff] }
   0xe   :  { %56 = vmatpush.msra.mxu0 %v43_v12  ;;  %178 = vmatpush.msra.mxu2 %v1421_v28  ;;  %v1476_v39 = vld [vmem:[%s2234_s2 + $0x18] sm:$0xff]  ;;  %v1484_v40 = vld [vmem:[%s2234_s2 + $0xc0] sm:$0xff]  ;;  %v36_v42 = vld [vmem:[%s2233_s1 + $0x10] sm:$0xff] }
   0xf   :  { %141 = vmatpush.msra.mxu1 %v1342_v13  ;;  %218 = vmatpush.msra.mxu3 %v1426_v29  ;;  %v1489_v41 = vld [vmem:[%s2235_s3 + $0x40] sm:$0xff]  ;;  %v1497_v43 = vld [vmem:[%s2234_s2 + $0x10] sm:$0xff]  ;;  %v1505_v44 = vld [vmem:[%s2234_s2 + $0xb8] sm:$0xff] }
  0x10   :  { %57 = vmatpush.msra.mxu0 %v42_v17  ;;  %179 = vmatpush.msra.mxu2 %v1442_v32  ;;  %v1510_v45 = vld [vmem:[%s2235_s3 + $0x38] sm:$0xff]  ;;  %v35_v46 = vld [vmem:[%s2233_s1 + $0x8] sm:$0xff]  ;;  %v1526_v48 = vld [vmem:[%s2234_s2 + $0xb0] sm:$0xff] }
  0x11   :  { %142 = vmatpush.msra.mxu1 %v1366_v18  ;;  %219 = vmatpush.msra.mxu3 %v1447_v33  ;;  %v1518_v47 = vld [vmem:[%s2234_s2 + $0x8] sm:$0xff]  ;;  %v1531_v49 = vld [vmem:[%s2235_s3 + $0x30] sm:$0xff]  ;;  %v34_v50 = vld [vmem:[%s2233_s1] sm:$0xff] }
  0x12   :  { %58 = vmatpush.msra.mxu0 %v41_v22  ;;  %180 = vmatpush.msra.mxu2 %v1463_v36  ;;  %v1539_v51 = vld [vmem:[%s2234_s2] sm:$0xff]  ;;  %v1552_v53 = vld [vmem:[%s2234_s2 + $0xa8] sm:$0xff]  ;;  %v1634_v58 = vld [vmem:[%s2234_s2 + $0x98] sm:$0xff] }
  0x13   :  { %143 = vmatpush.msra.mxu1 %v1392_v23  ;;  %220 = vmatpush.msra.mxu3 %v1468_v37  ;;  %v26_v52 = vld [vmem:[%s2237_s0] sm:$0xff]  ;;  %v1558_v54 = vld [vmem:[%s2235_s3 + $0x28] sm:$0xff]  ;;  %v1639_v59 = vld [vmem:[%s2235_s3 + $0x18] sm:$0xff] }
  0x14   :  { %59 = vmatpush.msra.mxu0 %v40_v26  ;;  %181 = vmatpush.msra.mxu2 %v1484_v40  ;;  %v1564_v56 = vld [vmem:[%s2234_s2 + $0xa0] sm:$0xff]  ;;  %v1646_v60 = vld [vmem:[%s2234_s2 + $0x90] sm:$0xff]  ;;  %v1660_v62 = vld [vmem:[%s2234_s2 + $0x88] sm:$0xff] }
  0x15   :  { %144 = vmatpush.msra.mxu1 %v1413_v27  ;;  %221 = vmatpush.msra.mxu3 %v1489_v41  ;;  %v1571_v57 = vld [vmem:[%s2235_s3 + $0x20] sm:$0xff]  ;;  %v1651_v61 = vld [vmem:[%s2235_s3 + $0x10] sm:$0xff]  ;;  %v1665_v63 = vld [vmem:[%s2235_s3 + $0x8] sm:$0xff] }
  0x16   :  { %60 = vmatpush.msra.mxu0 %v39_v30  ;;  %182 = vmatpush.msra.mxu2 %v1505_v44  ;;  %v27_v0 = vld [vmem:[%s2237_s0 + $0x8] sm:$0xff]  ;;  %v1677_v1 = vld [vmem:[%s2234_s2 + $0x80] sm:$0xff]  ;;  %v28_v6 = vld [vmem:[%s2237_s0 + $0x10] sm:$0xff] }
  0x17   :  { %145 = vmatpush.msra.mxu1 %v1434_v31  ;;  %222 = vmatpush.msra.mxu3 %v1510_v45  ;;  %v1682_v4 = vld [vmem:[%s2235_s3] sm:$0xff]  ;;  %v29_v8 = vld [vmem:[%s2237_s0 + $0x18] sm:$0xff]  ;;  %v31_v30 = vld [vmem:[%s2237_s0 + $0x28] sm:$0xff] }
  0x18   :  { %61 = vmatpush.msra.mxu0 %v38_v34  ;;  %183 = vmatpush.msra.mxu2 %v1526_v48  ;;  %v30_v10 = vld [vmem:[%s2237_s0 + $0x20] sm:$0xff] }
  0x19   :  { %146 = vmatpush.msra.mxu1 %v1455_v35  ;;  %223 = vmatpush.msra.mxu3 %v1531_v49  ;;  %v1725_v12 = vld [vmem:[%s2236_s4] ss:$0 sm:$0xff] }
  0x1a   :  { %62 = vmatpush.msra.mxu0 %v37_v38  ;;  %184 = vmatpush.msra.mxu2 %v1552_v53 }
  0x1b   :  { %147 = vmatpush.msra.mxu1 %v1476_v39  ;;  %224 = vmatpush.msra.mxu3 %v1558_v54 }
  0x1c   :  { %63 = vmatpush.msra.mxu0 %v36_v42  ;;  %185 = vmatpush.msra.mxu2 %v1564_v56  ;;  %v32_v42 = vld [vmem:[%s2237_s0 + $0x30] sm:$0xff] }
  0x1d   :  { %148 = vmatpush.msra.mxu1 %v1497_v43  ;;  %225 = vmatpush.msra.mxu3 %v1571_v57 }
  0x1e   :  { %64 = vmatpush.msra.mxu0 %v35_v46  ;;  %186 = vmatpush.msra.mxu2 %v1634_v58  ;;  %v33_v46 = vld [vmem:[%s2237_s0 + $0x38] sm:$0xff] }
  0x1f   :  { %149 = vmatpush.msra.mxu1 %v1518_v47  ;;  %226 = vmatpush.msra.mxu3 %v1639_v59 }
  0x20   :  { %65 = vmatpush.msra.mxu0 %v34_v50  ;;  %187 = vmatpush.msra.mxu2 %v1646_v60 }
  0x21   :  { %150 = vmatpush.msra.mxu1 %v1539_v51  ;;  %66 = vmatmul.f32.vlgmr.msra.gmra.mxu0 %v26_v52 }
  0x22   :  { %151 = vmatmul.f32.vlgmr.msra.gmra.mxu1 %v1242_v55  ;;  %372 = vmatpush.msrb.mxu0 %v1292_v2 }
  0x23   :  { %254 = vmatpush.msrb.mxu1 %v1292_v2  ;;  %227 = vmatpush.msra.mxu3 %v1651_v61 }
  0x24   :  { %373 = vmatpush.msrb.mxu0 %v1298_v3  ;;  %188 = vmatpush.msra.mxu2 %v1660_v62 }
  0x25   :  { %255 = vmatpush.msrb.mxu1 %v1298_v3  ;;  %228 = vmatpush.msra.mxu3 %v1665_v63 }
  0x26   :  { %374 = vmatpush.msrb.mxu0 %v1306_v5  ;;  %189 = vmatpush.msra.mxu2 %v1677_v1 }
  0x27   :  { %256 = vmatpush.msrb.mxu1 %v1306_v5  ;;  %229 = vmatpush.msra.mxu3 %v1682_v4 }
  0x28   :  { %375 = vmatpush.msrb.mxu0 %v1315_v7  ;;  %190 = vmatmul.f32.vlgmr.msra.gmra.mxu2 %v1242_v55 }
  0x29   :  { %257 = vmatpush.msrb.mxu1 %v1315_v7  ;;  %69 = vmatmul.f32.gmra.mxu0 %v27_v0 }
  0x2a   :  { %376 = vmatpush.msrb.mxu0 %v1324_v9  ;;  %332 = vmatpush.msrb.mxu3 %v1353_v15 }
  0x2b   :  { %258 = vmatpush.msrb.mxu1 %v1324_v9  ;;  %291 = vmatpush.msrb.mxu2 %v1348_v14 }
  0x2c   :  { %377 = vmatpush.msrb.mxu0 %v1333_v11  ;;  %333 = vmatpush.msrb.mxu3 %v1373_v19 }
  0x2d   :  { %259 = vmatpush.msrb.mxu1 %v1333_v11  ;;  %292 = vmatpush.msrb.mxu2 %v1358_v16 }
  0x2e   :  { %378 = vmatpush.msrb.mxu0 %v1342_v13  ;;  %334 = vmatpush.msrb.mxu3 %v1384_v21 }
  0x2f   :  { %260 = vmatpush.msrb.mxu1 %v1342_v13  ;;  %293 = vmatpush.msrb.mxu2 %v1379_v20 }
  0x30   :  { %379 = vmatpush.msrb.mxu0 %v1366_v18  ;;  %335 = vmatpush.msrb.mxu3 %v1405_v25 }
  0x31   :  { %261 = vmatpush.msrb.mxu1 %v1366_v18  ;;  %72 = vmatmul.f32.gmra.mxu0 %v28_v6 }
  0x32   :  { %380 = vmatpush.msrb.mxu0 %v1392_v23  ;;  %294 = vmatpush.msrb.mxu2 %v1400_v24 }
  0x33   :  { %262 = vmatpush.msrb.mxu1 %v1392_v23  ;;  %336 = vmatpush.msrb.mxu3 %v1426_v29 }
  0x34   :  { %381 = vmatpush.msrb.mxu0 %v1413_v27  ;;  %295 = vmatpush.msrb.mxu2 %v1421_v28 }
  0x35   :  { %263 = vmatpush.msrb.mxu1 %v1413_v27  ;;  %337 = vmatpush.msrb.mxu3 %v1447_v33 }
  0x36   :  { %382 = vmatpush.msrb.mxu0 %v1434_v31  ;;  %296 = vmatpush.msrb.mxu2 %v1442_v32 }
  0x37   :  { %264 = vmatpush.msrb.mxu1 %v1434_v31  ;;  %338 = vmatpush.msrb.mxu3 %v1468_v37 }
  0x38   :  { %383 = vmatpush.msrb.mxu0 %v1455_v35  ;;  %297 = vmatpush.msrb.mxu2 %v1463_v36 }
  0x39   :  { %265 = vmatpush.msrb.mxu1 %v1455_v35  ;;  %75 = vmatmul.f32.gmra.mxu0 %v29_v8 }
  0x3a   :  { %384 = vmatpush.msrb.mxu0 %v1476_v39  ;;  %339 = vmatpush.msrb.mxu3 %v1489_v41 }
  0x3b   :  { %266 = vmatpush.msrb.mxu1 %v1476_v39  ;;  %298 = vmatpush.msrb.mxu2 %v1484_v40 }
  0x3c   :  { %385 = vmatpush.msrb.mxu0 %v1497_v43  ;;  %340 = vmatpush.msrb.mxu3 %v1510_v45 }
  0x3d   :  { %267 = vmatpush.msrb.mxu1 %v1497_v43  ;;  %299 = vmatpush.msrb.mxu2 %v1505_v44 }
  0x3e   :  { %386 = vmatpush.msrb.mxu0 %v1518_v47  ;;  %341 = vmatpush.msrb.mxu3 %v1531_v49 }
  0x3f   :  { %268 = vmatpush.msrb.mxu1 %v1518_v47  ;;  %300 = vmatpush.msrb.mxu2 %v1526_v48 }
  0x40   :  { %387 = vmatpush.msrb.mxu0 %v1539_v51  ;;  %342 = vmatpush.msrb.mxu3 %v1558_v54 }
  0x41   :  { %269 = vmatpush.msrb.mxu1 %v1539_v51  ;;  %301 = vmatpush.msrb.mxu2 %v1552_v53 }
  0x42   :  { %527 = vmatpush.msra.mxu0 %v1348_v14  ;;  %343 = vmatpush.msrb.mxu3 %v1571_v57 }
  0x43   :  { %409 = vmatpush.msra.mxu1 %v1348_v14  ;;  %78 = vmatmul.f32.gmra.mxu0 %v30_v10  ;;  %v1799_v10 = vld [vmem:[%s2236_s4 + $0x1] ss:$0 sm:$0xff] }
  0x44   :  { %528 = vmatpush.msra.mxu0 %v1358_v16  ;;  %302 = vmatpush.msrb.mxu2 %v1564_v56 }
  0x45   :  { %410 = vmatpush.msra.mxu1 %v1358_v16  ;;  %344 = vmatpush.msrb.mxu3 %v1639_v59 }
  0x46   :  { %529 = vmatpush.msra.mxu0 %v1379_v20  ;;  %303 = vmatpush.msrb.mxu2 %v1634_v58 }
  0x47   :  { %411 = vmatpush.msra.mxu1 %v1379_v20  ;;  %345 = vmatpush.msrb.mxu3 %v1651_v61 }
  0x48   :  { %530 = vmatpush.msra.mxu0 %v1400_v24  ;;  %304 = vmatpush.msrb.mxu2 %v1646_v60 }
  0x49   :  { %412 = vmatpush.msra.mxu1 %v1400_v24  ;;  %346 = vmatpush.msrb.mxu3 %v1665_v63 }
  0x4a   :  { %531 = vmatpush.msra.mxu0 %v1421_v28  ;;  %305 = vmatpush.msrb.mxu2 %v1660_v62 }
  0x4b   :  { %413 = vmatpush.msra.mxu1 %v1421_v28  ;;  %81 = vmatmul.f32.gmra.mxu0 %v31_v30 }
  0x4c   :  { %532 = vmatpush.msra.mxu0 %v1442_v32  ;;  %347 = vmatpush.msrb.mxu3 %v1682_v4 }
  0x4d   :  { %414 = vmatpush.msra.mxu1 %v1442_v32  ;;  %306 = vmatpush.msrb.mxu2 %v1677_v1 }
  0x4e   :  { %533 = vmatpush.msra.mxu0 %v1463_v36 }
  0x4f   :  { %415 = vmatpush.msra.mxu1 %v1463_v36  ;;  %450 = vmatpush.msra.mxu2 %v1353_v15 }
  0x50   :  { %534 = vmatpush.msra.mxu0 %v1484_v40 }
  0x51   :  { %416 = vmatpush.msra.mxu1 %v1484_v40  ;;  %451 = vmatpush.msra.mxu2 %v1373_v19 }
  0x52   :  { %535 = vmatpush.msra.mxu0 %v1505_v44 }
  0x53   :  { %417 = vmatpush.msra.mxu1 %v1505_v44  ;;  %452 = vmatpush.msra.mxu2 %v1384_v21 }
  0x54   :  { %536 = vmatpush.msra.mxu0 %v1526_v48 }
  0x55   :  { %418 = vmatpush.msra.mxu1 %v1526_v48  ;;  %84 = vmatmul.f32.gmra.mxu0 %v32_v42  ;;  %v1201_v42 = vld [vmem:[%s2234_s2 + $0xd8] sm:$0xff] }
  0x56   :  { %537 = vmatpush.msra.mxu0 %v1552_v53  ;;  %453 = vmatpush.msra.mxu2 %v1405_v25 }
  0x57   :  { %419 = vmatpush.msra.mxu1 %v1552_v53 }
  0x58   :  { %538 = vmatpush.msra.mxu0 %v1564_v56  ;;  %454 = vmatpush.msra.mxu2 %v1426_v29 }
  0x59   :  { %420 = vmatpush.msra.mxu1 %v1564_v56 }
  0x5a   :  { %539 = vmatpush.msra.mxu0 %v1634_v58  ;;  %455 = vmatpush.msra.mxu2 %v1447_v33 }
  0x5b   :  { %421 = vmatpush.msra.mxu1 %v1634_v58 }
  0x5c   :  { %540 = vmatpush.msra.mxu0 %v1646_v60  ;;  %456 = vmatpush.msra.mxu2 %v1468_v37 }
  0x5d   :  { %422 = vmatpush.msra.mxu1 %v1646_v60  ;;  %87 = vmatmul.f32.gmra.mxu0 %v33_v46  ;;  %v2027_v46 = vld [vmem:[%s2235_s3 + $0x48] sm:$0xff] }
  0x5e   :  { %541 = vmatpush.msra.mxu0 %v1660_v62  ;;  %457 = vmatpush.msra.mxu2 %v1489_v41 }
  0x5f   :  { %423 = vmatpush.msra.mxu1 %v1660_v62 }
  0x60   :  { %542 = vmatpush.msra.mxu0 %v1677_v1  ;;  %458 = vmatpush.msra.mxu2 %v1510_v45 }
  0x61   :  { %424 = vmatpush.msra.mxu1 %v1677_v1 }
  0x62   :  { %459 = vmatpush.msra.mxu2 %v1531_v49 }
  0x64   :  { %460 = vmatpush.msra.mxu2 %v1558_v54 }
  0x66   :  { %461 = vmatpush.msra.mxu2 %v1571_v57 }
  0x68   :  { %462 = vmatpush.msra.mxu2 %v1639_v59 }
  0x6a   :  { %463 = vmatpush.msra.mxu2 %v1651_v61 }
  0x6c   :  { %464 = vmatpush.msra.mxu2 %v1665_v63 }
  0x6e   :  { %465 = vmatpush.msra.mxu2 %v1682_v4 }
  0x9e   :  { %v67_v17 = vpop.f32.mrf.mxu0 }
  0x9f   :  { %v152_v22 = vpop.f32.mrf.mxu1  ;;  %v95_v26 = vadd.f32 %v1725_v12, %v67_v17 }
  0xa1   :  { %v195_v34 = vadd.f32 %v152_v22, %v95_v26 }
  0xa3   :  { %v196_v38 = vmax.f32 %v195_v34, 0.0  ;;  %v1202_v34 = vld [vmem:[%s2234_s2 + $0xe0] sm:$0xff] }
  0xa5   :  { %230 = vmatmul.f32.vlgmr.msra.gmra.mxu3 %v196_v38  ;;  %270 = vmatmul.f32.vlgmr.msrb.gmra.mxu1 %v196_v38  ;;  %v2018_v38 = vld [vmem:[%s2235_s3 + $0x50] sm:$0xff] }
  0xa6   :  { %490 = vmatpush.msra.mxu3 %v1292_v2  ;;  %568 = vmatpush.msrb.mxu1 %v1353_v15  ;;  %v70_v50 = vpop.f32.mrf.mxu0 }
  0xa7   :  { %v96_v52 = vadd.f32 %v1725_v12, %v70_v50  ;;  %v2033_v50 = vld [vmem:[%s2235_s3 + $0x40] sm:$0xff] }
  0xa8   :  { %491 = vmatpush.msra.mxu3 %v1298_v3  ;;  %569 = vmatpush.msrb.mxu1 %v1373_v19 }
  0xaa   :  { %492 = vmatpush.msra.mxu3 %v1306_v5  ;;  %570 = vmatpush.msrb.mxu1 %v1384_v21 }
  0xab   :  { %v191_v8 = vpop.f32.mrf.mxu2 }
  0xac   :  { %493 = vmatpush.msra.mxu3 %v1315_v7  ;;  %571 = vmatpush.msrb.mxu1 %v1405_v25 }
  0xae   :  { %494 = vmatpush.msra.mxu3 %v1324_v9  ;;  %572 = vmatpush.msrb.mxu1 %v1426_v29 }
  0xb0   :  { %495 = vmatpush.msra.mxu3 %v1333_v11  ;;  %573 = vmatpush.msrb.mxu1 %v1447_v33 }
  0xb2   :  { %496 = vmatpush.msra.mxu3 %v1342_v13  ;;  %574 = vmatpush.msrb.mxu1 %v1468_v37 }
  0xb4   :  { %497 = vmatpush.msra.mxu3 %v1366_v18  ;;  %575 = vmatpush.msrb.mxu1 %v1489_v41 }
  0xb6   :  { %498 = vmatpush.msra.mxu3 %v1392_v23  ;;  %576 = vmatpush.msrb.mxu1 %v1510_v45 }
  0xb8   :  { %499 = vmatpush.msra.mxu3 %v1413_v27  ;;  %577 = vmatpush.msrb.mxu1 %v1531_v49 }
  0xba   :  { %500 = vmatpush.msra.mxu3 %v1434_v31  ;;  %578 = vmatpush.msrb.mxu1 %v1558_v54 }
  0xbc   :  { %501 = vmatpush.msra.mxu3 %v1455_v35  ;;  %579 = vmatpush.msrb.mxu1 %v1571_v57 }
  0xbe   :  { %502 = vmatpush.msra.mxu3 %v1476_v39  ;;  %580 = vmatpush.msrb.mxu1 %v1639_v59 }
  0xc0   :  { %503 = vmatpush.msra.mxu3 %v1497_v43  ;;  %581 = vmatpush.msrb.mxu1 %v1651_v61 }
  0xc2   :  { %504 = vmatpush.msra.mxu3 %v1518_v47  ;;  %582 = vmatpush.msrb.mxu1 %v1665_v63 }
  0xc4   :  { %505 = vmatpush.msra.mxu3 %v1539_v51  ;;  %583 = vmatpush.msrb.mxu1 %v1682_v4 }
 0x122   :  { %v271_v55 = vpop.f32.mrf.mxu1 }
 0x123   :  { %v313_v0 = vadd.f32 %v271_v55, %v96_v52  ;;  %v2039_v52 = vld [vmem:[%s2235_s3 + $0x38] sm:$0xff]  ;;  %v2045_v55 = vld [vmem:[%s2235_s3 + $0x30] sm:$0xff] }
 0x125   :  { %v314_v6 = vmax.f32 %v313_v0, 0.0 }
 0x127   :  { %348 = vmatmul.f32.vlgmr.msrb.gmra.mxu3 %v314_v6  ;;  %388 = vmatmul.f32.vlgmr.msrb.gmra.mxu0 %v314_v6  ;;  %v2053_v6 = vld [vmem:[%s2235_s3 + $0x28] sm:$0xff] }
 0x128   :  { %v231_v17 = vpop.f32.mrf.mxu3  ;;  %686 = vmatpush.msrb.mxu0 %v1353_v15  ;;  %645 = vmatpush.msrb.mxu3 %v1348_v14 }
 0x129   :  { %v232_v22 = vadd.f32 %v231_v17, %v191_v8 }
 0x12a   :  { %687 = vmatpush.msrb.mxu0 %v1373_v19  ;;  %646 = vmatpush.msrb.mxu3 %v1358_v16 }
 0x12b   :  { %v234_v26 = vadd.f32 %v1799_v10, %v232_v22  ;;  %v2059_v22 = vld [vmem:[%s2235_s3 + $0x20] sm:$0xff] }
 0x12c   :  { %688 = vmatpush.msrb.mxu0 %v1384_v21  ;;  %647 = vmatpush.msrb.mxu3 %v1379_v20 }
 0x12d   :  { %v235_v30 = vmax.f32 %v234_v26, 0.0 }
 0x12e   :  { %689 = vmatpush.msrb.mxu0 %v1405_v25  ;;  %648 = vmatpush.msrb.mxu3 %v1400_v24  ;;  %v1863_v24 = vld [vmem:[%s2234_s2 + $0x78] sm:$0xff]  ;;  %v1868_v25 = vld [vmem:[%s2234_s2 + $0x70] sm:$0xff] }
 0x12f   :  { %307 = vmatmul.f32.vlgmr.msrb.gmra.mxu2 %v235_v30  ;;  %v2065_v30 = vld [vmem:[%s2235_s3 + $0x18] sm:$0xff] }
 0x130   :  { %608 = vmatpush.msrb.mxu2 %v1292_v2  ;;  %690 = vmatpush.msrb.mxu0 %v1426_v29  ;;  %v73_v2 = vpop.f32.mrf.mxu0  ;;  %v1886_v29 = vld [vmem:[%s2234_s2 + $0x58] sm:$0xff] }
 0x131   :  { %649 = vmatpush.msrb.mxu3 %v1421_v28  ;;  %v1880_v28 = vld [vmem:[%s2234_s2 + $0x60] sm:$0xff] }
 0x132   :  { %609 = vmatpush.msrb.mxu2 %v1298_v3  ;;  %691 = vmatpush.msrb.mxu0 %v1447_v33  ;;  %v1904_v33 = vld [vmem:[%s2234_s2 + $0x40] sm:$0xff] }
 0x133   :  { %650 = vmatpush.msrb.mxu3 %v1442_v32  ;;  %v1898_v32 = vld [vmem:[%s2234_s2 + $0x48] sm:$0xff] }
 0x134   :  { %610 = vmatpush.msrb.mxu2 %v1306_v5  ;;  %692 = vmatpush.msrb.mxu0 %v1468_v37 }
 0x135   :  { %651 = vmatpush.msrb.mxu3 %v1463_v36  ;;  %v1911_v36 = vld [vmem:[%s2234_s2 + $0x38] sm:$0xff] }
 0x136   :  { %611 = vmatpush.msrb.mxu2 %v1315_v7  ;;  %693 = vmatpush.msrb.mxu0 %v1489_v41 }
 0x137   :  { %652 = vmatpush.msrb.mxu3 %v1484_v40  ;;  %v1917_v40 = vld [vmem:[%s2234_s2 + $0x30] sm:$0xff] }
 0x138   :  { %612 = vmatpush.msrb.mxu2 %v1324_v9  ;;  %694 = vmatpush.msrb.mxu0 %v1510_v45  ;;  %v76_v3 = vpop.f32.mrf.mxu0 }
 0x139   :  { %653 = vmatpush.msrb.mxu3 %v1505_v44 }
 0x13a   :  { %613 = vmatpush.msrb.mxu2 %v1333_v11  ;;  %695 = vmatpush.msrb.mxu0 %v1531_v49  ;;  %v1935_v49 = vld [vmem:[%s2234_s2 + $0x28] sm:$0xff] }
 0x13b   :  { %654 = vmatpush.msrb.mxu3 %v1526_v48 }
 0x13c   :  { %614 = vmatpush.msrb.mxu2 %v1342_v13  ;;  %696 = vmatpush.msrb.mxu0 %v1558_v54  ;;  %v97_v13 = vadd.f32 %v1725_v12, %v73_v2  ;;  %v1956_v54 = vld [vmem:[%s2234_s2 + $0x10] sm:$0xff] }
 0x13d   :  { %655 = vmatpush.msrb.mxu3 %v1552_v53  ;;  %v1947_v53 = vld [vmem:[%s2234_s2 + $0x18] sm:$0xff] }
 0x13e   :  { %615 = vmatpush.msrb.mxu2 %v1366_v18  ;;  %697 = vmatpush.msrb.mxu0 %v1571_v57  ;;  %v1970_v57 = vld [vmem:[%s2234_s2] sm:$0xff] }
 0x13f   :  { %656 = vmatpush.msrb.mxu3 %v1564_v56  ;;  %v1963_v56 = vld [vmem:[%s2234_s2 + $0x8] sm:$0xff] }
 0x140   :  { %616 = vmatpush.msrb.mxu2 %v1392_v23  ;;  %698 = vmatpush.msrb.mxu0 %v1639_v59  ;;  %v1850_v5 = vpop.f32.mrf.mxu0  ;;  %v1982_v59 = vld [vmem:[%s2235_s3 + $0x70] sm:$0xff] }
 0x141   :  { %657 = vmatpush.msrb.mxu3 %v1634_v58  ;;  %v1977_v58 = vld [vmem:[%s2235_s3 + $0x78] sm:$0xff]  ;;  %v99_v0 = vadd.f32 %v1725_v12, %v1850_v5 }
 0x142   :  { %617 = vmatpush.msrb.mxu2 %v1413_v27  ;;  %699 = vmatpush.msrb.mxu0 %v1651_v61  ;;  %v1874_v27 = vld [vmem:[%s2234_s2 + $0x68] sm:$0xff]  ;;  %v1205_v61 = vld [vmem:[%s2234_s2 + $0xf8] sm:$0xff] }
 0x143   :  { %658 = vmatpush.msrb.mxu3 %v1646_v60  ;;  %v1988_v60 = vld [vmem:[%s2235_s3 + $0x68] sm:$0xff] }
 0x144   :  { %618 = vmatpush.msrb.mxu2 %v1434_v31  ;;  %700 = vmatpush.msrb.mxu0 %v1665_v63  ;;  %v1892_v31 = vld [vmem:[%s2234_s2 + $0x50] sm:$0xff]  ;;  %v2000_v63 = vld [vmem:[%s2235_s3 + $0x60] sm:$0xff] }
 0x145   :  { %659 = vmatpush.msrb.mxu3 %v1660_v62  ;;  %v1204_v62 = vld [vmem:[%s2234_s2 + $0xf0] sm:$0xff] }
 0x146   :  { %619 = vmatpush.msrb.mxu2 %v1455_v35  ;;  %701 = vmatpush.msrb.mxu0 %v1682_v4  ;;  %v98_v35 = vadd.f32 %v1725_v12, %v76_v3  ;;  %v2009_v4 = vld [vmem:[%s2235_s3 + $0x58] sm:$0xff] }
 0x147   :  { %660 = vmatpush.msrb.mxu3 %v1677_v1  ;;  %v1203_v1 = vld [vmem:[%s2234_s2 + $0xe8] sm:$0xff] }
 0x148   :  { %620 = vmatpush.msrb.mxu2 %v1476_v39  ;;  %v1852_v7 = vpop.f32.mrf.mxu0 }
 0x14a   :  { %621 = vmatpush.msrb.mxu2 %v1497_v43 }
 0x14c   :  { %622 = vmatpush.msrb.mxu2 %v1518_v47 }
 0x14e   :  { %623 = vmatpush.msrb.mxu2 %v1539_v51  ;;  %v1941_v51 = vld [vmem:[%s2234_s2 + $0x20] sm:$0xff] }
 0x150   :  { %v1854_v9 = vpop.f32.mrf.mxu0 }
 0x158   :  { %v1856_v11 = vpop.f32.mrf.mxu0 }
 0x1a4   :  { %v389_v14 = vpop.f32.mrf.mxu0 }
 0x1a5   :  { %v431_v15 = vadd.f32 %v389_v14, %v97_v13 }
 0x1a7   :  { %v432_v16 = vmax.f32 %v431_v15, 0.0  ;;  %v1200_v15 = vld [vmem:[%s2234_s2 + $0xd0] sm:$0xff] }
 0x1a9   :  { %466 = vmatmul.f32.vlgmr.msra.gmra.mxu2 %v432_v16  ;;  %506 = vmatmul.f32.vlgmr.msra.gmra.mxu3 %v432_v16  ;;  %v2076_v16 = vld [vmem:[%s2235_s3 + $0x10] sm:$0xff] }
 0x1aa   :  { %v349_v18 = vpop.f32.mrf.mxu3  ;;  %804 = vmatpush.msra.mxu3 %v1977_v58  ;;  %763 = vmatpush.msra.mxu2 %v1205_v61 }
 0x1ac   :  { %805 = vmatpush.msra.mxu3 %v1982_v59  ;;  %764 = vmatpush.msra.mxu2 %v1204_v62 }
 0x1ae   :  { %806 = vmatpush.msra.mxu3 %v1988_v60  ;;  %765 = vmatpush.msra.mxu2 %v1203_v1 }
 0x1b0   :  { %807 = vmatpush.msra.mxu3 %v2000_v63  ;;  %766 = vmatpush.msra.mxu2 %v1202_v34 }
 0x1b2   :  { %v308_v19 = vpop.f32.mrf.mxu2  ;;  %808 = vmatpush.msra.mxu3 %v2009_v4  ;;  %767 = vmatpush.msra.mxu2 %v1201_v42 }
 0x1b3   :  { %v350_v20 = vadd.f32 %v349_v18, %v308_v19  ;;  %v1199_v18 = vld [vmem:[%s2234_s2 + $0xc8] sm:$0xff] }
 0x1b4   :  { %809 = vmatpush.msra.mxu3 %v2018_v38  ;;  %768 = vmatpush.msra.mxu2 %v1200_v15  ;;  %v2085_v19 = vld [vmem:[%s2235_s3 + $0x8] sm:$0xff] }
 0x1b5   :  { %v352_v21 = vadd.f32 %v1799_v10, %v350_v20  ;;  %v1198_v20 = vld [vmem:[%s2234_s2 + $0xc0] sm:$0xff] }
 0x1b6   :  { %810 = vmatpush.msra.mxu3 %v2027_v46  ;;  %769 = vmatpush.msra.mxu2 %v1199_v18 }
 0x1b7   :  { %v353_v23 = vmax.f32 %v352_v21, 0.0  ;;  %v2094_v21 = vld [vmem:[%s2235_s3] sm:$0xff] }
 0x1b8   :  { %811 = vmatpush.msra.mxu3 %v2033_v50  ;;  %770 = vmatpush.msra.mxu2 %v1198_v20 }
 0x1b9   :  { %425 = vmatmul.f32.vlgmr.msra.gmra.mxu1 %v353_v23  ;;  %v1197_v23 = vld [vmem:[%s2234_s2 + $0xb8] sm:$0xff] }
 0x1ba   :  { %726 = vmatpush.msra.mxu1 %v1863_v24  ;;  %812 = vmatpush.msra.mxu3 %v2039_v52 }
 0x1bb   :  { %771 = vmatpush.msra.mxu2 %v1197_v23 }
 0x1bc   :  { %727 = vmatpush.msra.mxu1 %v1868_v25  ;;  %813 = vmatpush.msra.mxu3 %v2045_v55 }
 0x1be   :  { %728 = vmatpush.msra.mxu1 %v1874_v27  ;;  %814 = vmatpush.msra.mxu3 %v2053_v6 }
 0x1c0   :  { %729 = vmatpush.msra.mxu1 %v1880_v28  ;;  %815 = vmatpush.msra.mxu3 %v2059_v22 }
 0x1c2   :  { %730 = vmatpush.msra.mxu1 %v1886_v29  ;;  %816 = vmatpush.msra.mxu3 %v2065_v30 }
 0x1c4   :  { %731 = vmatpush.msra.mxu1 %v1892_v31  ;;  %817 = vmatpush.msra.mxu3 %v2076_v16 }
 0x1c6   :  { %732 = vmatpush.msra.mxu1 %v1898_v32  ;;  %818 = vmatpush.msra.mxu3 %v2085_v19 }
 0x1c8   :  { %733 = vmatpush.msra.mxu1 %v1904_v33  ;;  %819 = vmatpush.msra.mxu3 %v2094_v21 }
 0x1ca   :  { %734 = vmatpush.msra.mxu1 %v1911_v36 }
 0x1cc   :  { %735 = vmatpush.msra.mxu1 %v1917_v40 }
 0x1ce   :  { %736 = vmatpush.msra.mxu1 %v1935_v49 }
 0x1d0   :  { %737 = vmatpush.msra.mxu1 %v1941_v51 }
 0x1d2   :  { %738 = vmatpush.msra.mxu1 %v1947_v53 }
 0x1d4   :  { %739 = vmatpush.msra.mxu1 %v1956_v54 }
 0x1d6   :  { %740 = vmatpush.msra.mxu1 %v1963_v56 }
 0x1d8   :  { %741 = vmatpush.msra.mxu1 %v1970_v57 }
 0x22c   :  { %v507_v37 = vpop.f32.mrf.mxu3  ;;  %v467_v43 = vpop.f32.mrf.mxu2 }
 0x22d   :  { %v549_v39 = vadd.f32 %v507_v37, %v98_v35  ;;  %v1196_v35 = vld [vmem:[%s2234_s2 + $0xb0] sm:$0xff]  ;;  %v1195_v37 = vld [vmem:[%s2234_s2 + $0xa8] sm:$0xff] }
 0x22e   :  { %772 = vmatpush.msra.mxu2 %v1196_v35 }
 0x22f   :  { %v550_v41 = vmax.f32 %v549_v39, 0.0  ;;  %v1194_v39 = vld [vmem:[%s2234_s2 + $0xa0] sm:$0xff] }
 0x230   :  { %773 = vmatpush.msra.mxu2 %v1195_v37 }
 0x231   :  { %584 = vmatmul.f32.vlgmr.msrb.gmra.mxu1 %v550_v41  ;;  %624 = vmatmul.f32.vlgmr.msrb.gmra.mxu2 %v550_v41 }
 0x232   :  { %881 = vmatpush.msrb.mxu1 %v1205_v61  ;;  %774 = vmatpush.msra.mxu2 %v1194_v39 }
 0x234   :  { %882 = vmatpush.msrb.mxu1 %v1204_v62 }
 0x236   :  { %v426_v44 = vpop.f32.mrf.mxu1  ;;  %883 = vmatpush.msrb.mxu1 %v1203_v1 }
 0x237   :  { %v468_v45 = vadd.f32 %v467_v43, %v426_v44  ;;  %v101_v44 = vadd.f32 %v1725_v12, %v1854_v9  ;;  %v1078_v9 = vld [vmem:[%s2238_s5 + $0x70] sm:$0xff] }
 0x238   :  { %884 = vmatpush.msrb.mxu1 %v1202_v34 }
 0x239   :  { %v470_v47 = vadd.f32 %v1799_v10, %v468_v45 }
 0x23a   :  { %885 = vmatpush.msrb.mxu1 %v1201_v42 }
 0x23b   :  { %v471_v48 = vmax.f32 %v470_v47, 0.0 }
 0x23c   :  { %886 = vmatpush.msrb.mxu1 %v1200_v15 }
 0x23d   :  { %543 = vmatmul.f32.vlgmr.msra.gmra.mxu0 %v471_v48 }
 0x23e   :  { %844 = vmatpush.msra.mxu0 %v1863_v24  ;;  %887 = vmatpush.msrb.mxu1 %v1199_v18 }
 0x240   :  { %845 = vmatpush.msra.mxu0 %v1868_v25  ;;  %888 = vmatpush.msrb.mxu1 %v1198_v20 }
 0x242   :  { %846 = vmatpush.msra.mxu0 %v1874_v27  ;;  %889 = vmatpush.msrb.mxu1 %v1197_v23 }
 0x244   :  { %847 = vmatpush.msra.mxu0 %v1880_v28  ;;  %890 = vmatpush.msrb.mxu1 %v1196_v35 }
 0x246   :  { %848 = vmatpush.msra.mxu0 %v1886_v29  ;;  %891 = vmatpush.msrb.mxu1 %v1195_v37 }
 0x248   :  { %849 = vmatpush.msra.mxu0 %v1892_v31  ;;  %892 = vmatpush.msrb.mxu1 %v1194_v39 }
 0x24a   :  { %850 = vmatpush.msra.mxu0 %v1898_v32 }
 0x24c   :  { %851 = vmatpush.msra.mxu0 %v1904_v33 }
 0x24e   :  { %852 = vmatpush.msra.mxu0 %v1911_v36 }
 0x250   :  { %853 = vmatpush.msra.mxu0 %v1917_v40 }
 0x252   :  { %854 = vmatpush.msra.mxu0 %v1935_v49 }
 0x254   :  { %855 = vmatpush.msra.mxu0 %v1941_v51 }
 0x256   :  { %856 = vmatpush.msra.mxu0 %v1947_v53 }
 0x258   :  { %857 = vmatpush.msra.mxu0 %v1956_v54 }
 0x25a   :  { %858 = vmatpush.msra.mxu0 %v1963_v56 }
 0x25c   :  { %859 = vmatpush.msra.mxu0 %v1970_v57 }
 0x2ae   :  { %v585_v2 = vpop.f32.mrf.mxu1 }
 0x2b4   :  { %v625_v8 = vpop.f32.mrf.mxu2 }
 0x2b5   :  { %v667_v17 = vadd.f32 %v625_v8, %v99_v0  ;;  %v1069_v0 = vld [vmem:[%s2238_s5 + $0x28] sm:$0xff]  ;;  %v1067_v8 = vld [vmem:[%s2238_s5 + $0x18] sm:$0xff] }
 0x2b7   :  { %v668_v26 = vmax.f32 %v667_v17, 0.0  ;;  %v1066_v17 = vld [vmem:[%s2238_s5 + $0x10] sm:$0xff] }
 0x2b9   :  { %702 = vmatmul.f32.vlgmr.msrb.gmra.mxu0 %v668_v26  ;;  %742 = vmatmul.f32.vlgmr.msra.gmra.mxu1 %v668_v26  ;;  %v1064_v26 = vld [vmem:[%s2238_s5] sm:$0xff] }
 0x2ba   :  { %v544_v3 = vpop.f32.mrf.mxu0  ;;  %999 = vmatpush.msrb.mxu0 %v1205_v61 }
 0x2bb   :  { %v586_v5 = vadd.f32 %v585_v2, %v544_v3 }
 0x2bc   :  { %1000 = vmatpush.msrb.mxu0 %v1204_v62 }
 0x2bd   :  { %v588_v13 = vadd.f32 %v1799_v10, %v586_v5 }
 0x2be   :  { %1001 = vmatpush.msrb.mxu0 %v1203_v1 }
 0x2bf   :  { %v589_v14 = vmax.f32 %v588_v13, 0.0 }
 0x2c0   :  { %1002 = vmatpush.msrb.mxu0 %v1202_v34 }
 0x2c1   :  { %661 = vmatmul.f32.vlgmr.msrb.gmra.mxu3 %v589_v14  ;;  %v1241_v14 = vld [vmem:[%s2239_s6] ss:$0 sm:$0xff] }
 0x2c2   :  { %1003 = vmatpush.msrb.mxu0 %v1201_v42  ;;  %962 = vmatpush.msrb.mxu3 %v1863_v24  ;;  %v1193_v24 = vld [vmem:[%s2234_s2 + $0x98] sm:$0xff]  ;;  %v1074_v42 = vld [vmem:[%s2238_s5 + $0x50] sm:$0xff] }
 0x2c3   :  { %775 = vmatpush.msra.mxu2 %v1193_v24  ;;  %893 = vmatpush.msrb.mxu1 %v1193_v24 }
 0x2c4   :  { %1004 = vmatpush.msrb.mxu0 %v1200_v15  ;;  %963 = vmatpush.msrb.mxu3 %v1868_v25  ;;  %v1192_v25 = vld [vmem:[%s2234_s2 + $0x90] sm:$0xff] }
 0x2c5   :  { %776 = vmatpush.msra.mxu2 %v1192_v25  ;;  %894 = vmatpush.msrb.mxu1 %v1192_v25 }
 0x2c6   :  { %1005 = vmatpush.msrb.mxu0 %v1199_v18  ;;  %964 = vmatpush.msrb.mxu3 %v1874_v27  ;;  %v1191_v27 = vld [vmem:[%s2234_s2 + $0x88] sm:$0xff] }
 0x2c7   :  { %777 = vmatpush.msra.mxu2 %v1191_v27  ;;  %895 = vmatpush.msrb.mxu1 %v1191_v27 }
 0x2c8   :  { %1006 = vmatpush.msrb.mxu0 %v1198_v20  ;;  %965 = vmatpush.msrb.mxu3 %v1880_v28  ;;  %v1190_v28 = vld [vmem:[%s2234_s2 + $0x80] sm:$0xff] }
 0x2c9   :  { %778 = vmatpush.msra.mxu2 %v1190_v28  ;;  %896 = vmatpush.msrb.mxu1 %v1190_v28 }
 0x2ca   :  { %1007 = vmatpush.msrb.mxu0 %v1197_v23  ;;  %966 = vmatpush.msrb.mxu3 %v1886_v29  ;;  %v100_v29 = vadd.f32 %v1725_v12, %v1852_v7 }
 0x2cb   :  { %922 = vmatpush.msrb.mxu2 %v1977_v58  ;;  %1040 = vmatpush.msra.mxu1 %v1977_v58  ;;  %v102_v58 = vadd.f32 %v1725_v12, %v1856_v11  ;;  %v1076_v12 = vld [vmem:[%s2238_s5 + $0x60] sm:$0xff]  ;;  %v1075_v11 = vld [vmem:[%s2238_s5 + $0x58] sm:$0xff] }
 0x2cc   :  { %1008 = vmatpush.msrb.mxu0 %v1196_v35  ;;  %967 = vmatpush.msrb.mxu3 %v1892_v31 }
 0x2cd   :  { %923 = vmatpush.msrb.mxu2 %v1982_v59  ;;  %1041 = vmatpush.msra.mxu1 %v1982_v59 }
 0x2ce   :  { %1009 = vmatpush.msrb.mxu0 %v1195_v37  ;;  %968 = vmatpush.msrb.mxu3 %v1898_v32 }
 0x2cf   :  { %924 = vmatpush.msrb.mxu2 %v1988_v60  ;;  %1042 = vmatpush.msra.mxu1 %v1988_v60 }
 0x2d0   :  { %1010 = vmatpush.msrb.mxu0 %v1194_v39  ;;  %969 = vmatpush.msrb.mxu3 %v1904_v33 }
 0x2d1   :  { %925 = vmatpush.msrb.mxu2 %v2000_v63  ;;  %1043 = vmatpush.msra.mxu1 %v2000_v63 }
 0x2d2   :  { %1011 = vmatpush.msrb.mxu0 %v1193_v24  ;;  %970 = vmatpush.msrb.mxu3 %v1911_v36 }
 0x2d3   :  { %926 = vmatpush.msrb.mxu2 %v2009_v4  ;;  %1044 = vmatpush.msra.mxu1 %v2009_v4 }
 0x2d4   :  { %1012 = vmatpush.msrb.mxu0 %v1192_v25  ;;  %971 = vmatpush.msrb.mxu3 %v1917_v40 }
 0x2d5   :  { %927 = vmatpush.msrb.mxu2 %v2018_v38  ;;  %1045 = vmatpush.msra.mxu1 %v2018_v38  ;;  %v1077_v38 = vld [vmem:[%s2238_s5 + $0x68] sm:$0xff] }
 0x2d6   :  { %1013 = vmatpush.msrb.mxu0 %v1191_v27  ;;  %972 = vmatpush.msrb.mxu3 %v1935_v49 }
 0x2d7   :  { %928 = vmatpush.msrb.mxu2 %v2027_v46  ;;  %1046 = vmatpush.msra.mxu1 %v2027_v46  ;;  %v1073_v46 = vld [vmem:[%s2238_s5 + $0x48] sm:$0xff] }
 0x2d8   :  { %1014 = vmatpush.msrb.mxu0 %v1190_v28  ;;  %973 = vmatpush.msrb.mxu3 %v1941_v51 }
 0x2d9   :  { %929 = vmatpush.msrb.mxu2 %v2033_v50  ;;  %1047 = vmatpush.msra.mxu1 %v2033_v50  ;;  %v1072_v50 = vld [vmem:[%s2238_s5 + $0x40] sm:$0xff] }
 0x2da   :  { %974 = vmatpush.msrb.mxu3 %v1947_v53 }
 0x2db   :  { %930 = vmatpush.msrb.mxu2 %v2039_v52  ;;  %1048 = vmatpush.msra.mxu1 %v2039_v52  ;;  %v1071_v52 = vld [vmem:[%s2238_s5 + $0x38] sm:$0xff] }
 0x2dc   :  { %975 = vmatpush.msrb.mxu3 %v1956_v54 }
 0x2dd   :  { %931 = vmatpush.msrb.mxu2 %v2045_v55  ;;  %1049 = vmatpush.msra.mxu1 %v2045_v55  ;;  %v1070_v55 = vld [vmem:[%s2238_s5 + $0x30] sm:$0xff] }
 0x2de   :  { %976 = vmatpush.msrb.mxu3 %v1963_v56 }
 0x2df   :  { %932 = vmatpush.msrb.mxu2 %v2053_v6  ;;  %1050 = vmatpush.msra.mxu1 %v2053_v6  ;;  %v1068_v6 = vld [vmem:[%s2238_s5 + $0x20] sm:$0xff] }
 0x2e0   :  { %977 = vmatpush.msrb.mxu3 %v1970_v57  ;;  %v1079_v57 = vld [vmem:[%s2238_s5 + $0x78] sm:$0xff] }
 0x2e1   :  { %933 = vmatpush.msrb.mxu2 %v2059_v22  ;;  %1051 = vmatpush.msra.mxu1 %v2059_v22  ;;  %v1065_v22 = vld [vmem:[%s2238_s5 + $0x8] sm:$0xff] }
 0x2e3   :  { %934 = vmatpush.msrb.mxu2 %v2065_v30  ;;  %1052 = vmatpush.msra.mxu1 %v2065_v30 }
 0x2e5   :  { %935 = vmatpush.msrb.mxu2 %v2076_v16  ;;  %1053 = vmatpush.msra.mxu1 %v2076_v16 }
 0x2e7   :  { %936 = vmatpush.msrb.mxu2 %v2085_v19  ;;  %1054 = vmatpush.msra.mxu1 %v2085_v19 }
 0x2e9   :  { %937 = vmatpush.msrb.mxu2 %v2094_v21  ;;  %1055 = vmatpush.msra.mxu1 %v2094_v21 }
 0x336   :  { %v743_v31 = vpop.f32.mrf.mxu1  ;;  %v703_v7 = vpop.f32.mrf.mxu0 }
 0x337   :  { %v785_v32 = vadd.f32 %v743_v31, %v100_v29 }
 0x339   :  { %v786_v33 = vmax.f32 %v785_v32, 0.0 }
 0x33b   :  { %820 = vmatmul.f32.vlgmr.msra.gmra.mxu3 %v786_v33  ;;  %860 = vmatmul.f32.vlgmr.msra.gmra.mxu0 %v786_v33 }
 0x344   :  { %v662_v36 = vpop.f32.mrf.mxu3 }
 0x345   :  { %v704_v40 = vadd.f32 %v703_v7, %v662_v36 }
 0x347   :  { %v706_v41 = vadd.f32 %v1799_v10, %v704_v40 }
 0x349   :  { %v707_v43 = vmax.f32 %v706_v41, 0.0 }
 0x34b   :  { %779 = vmatmul.f32.vlgmr.msra.gmra.mxu2 %v707_v43 }
 0x34c   :  { %1084 = vmatpush.msra.mxu2 %v1079_v57 }
 0x34e   :  { %1085 = vmatpush.msra.mxu2 %v1078_v9 }
 0x350   :  { %1086 = vmatpush.msra.mxu2 %v1077_v38 }
 0x352   :  { %1087 = vmatpush.msra.mxu2 %v1076_v12 }
 0x354   :  { %1088 = vmatpush.msra.mxu2 %v1075_v11 }
 0x356   :  { %1089 = vmatpush.msra.mxu2 %v1074_v42 }
 0x358   :  { %1090 = vmatpush.msra.mxu2 %v1073_v46 }
 0x35a   :  { %1091 = vmatpush.msra.mxu2 %v1072_v50 }
 0x35c   :  { %1092 = vmatpush.msra.mxu2 %v1071_v52 }
 0x35e   :  { %1093 = vmatpush.msra.mxu2 %v1070_v55 }
 0x360   :  { %1094 = vmatpush.msra.mxu2 %v1069_v0 }
 0x362   :  { %1095 = vmatpush.msra.mxu2 %v1068_v6 }
 0x364   :  { %1096 = vmatpush.msra.mxu2 %v1067_v8 }
 0x366   :  { %1097 = vmatpush.msra.mxu2 %v1066_v17 }
 0x368   :  { %1098 = vmatpush.msra.mxu2 %v1065_v22 }
 0x36a   :  { %1099 = vmatpush.msra.mxu2 %v1064_v26 }
 0x3b8   :  { %v861_v45 = vpop.f32.mrf.mxu0 }
 0x3b9   :  { %v903_v47 = vadd.f32 %v861_v45, %v101_v44 }
 0x3bb   :  { %v904_v48 = vmax.f32 %v903_v47, 0.0 }
 0x3bd   :  { %938 = vmatmul.f32.vlgmr.msrb.gmra.mxu2 %v904_v48  ;;  %978 = vmatmul.f32.vlgmr.msrb.gmra.mxu3 %v904_v48 }
 0x3be   :  { %v821_v49 = vpop.f32.mrf.mxu3 }
 0x3ce   :  { %v780_v51 = vpop.f32.mrf.mxu2 }
 0x3cf   :  { %v822_v53 = vadd.f32 %v821_v49, %v780_v51 }
 0x3d1   :  { %v824_v54 = vadd.f32 %v1799_v10, %v822_v53 }
 0x3d3   :  { %v825_v56 = vmax.f32 %v824_v54, 0.0 }
 0x3d5   :  { %897 = vmatmul.f32.vlgmr.msrb.gmra.mxu1 %v825_v56 }
 0x440   :  { %v979_v59 = vpop.f32.mrf.mxu3  ;;  %v939_v62 = vpop.f32.mrf.mxu2 }
 0x441   :  { %v1021_v60 = vadd.f32 %v979_v59, %v102_v58 }
 0x443   :  { %v1022_v61 = vmax.f32 %v1021_v60, 0.0 }
 0x445   :  { %1056 = vmatmul.f32.vlgmr.msra.gmra.mxu1 %v1022_v61 }
 0x452   :  { %v898_v63 = vpop.f32.mrf.mxu1 }
 0x453   :  { %v940_v1 = vadd.f32 %v939_v62, %v898_v63 }
 0x455   :  { %v942_v4 = vadd.f32 %v1799_v10, %v940_v1 }
 0x457   :  { %v943_v34 = vmax.f32 %v942_v4, 0.0 }
 0x459   :  { %1015 = vmatmul.f32.vlgmr.msrb.gmra.mxu0 %v943_v34 }
 0x4c2   :  { %v1057_v30 = vpop.f32.mrf.mxu1 }
 0x4d6   :  { %v1016_v2 = vpop.f32.mrf.mxu0 }
 0x4d7   :  { %v1058_v3 = vadd.f32 %v1057_v30, %v1016_v2 }
 0x4d9   :  { %v1060_v5 = vadd.f32 %v1799_v10, %v1058_v3 }
 0x4db   :  { %v1061_v13 = vmax.f32 %v1060_v5, 0.0 }
 0x4dd   :  { %1100 = vmatmul.f32.vlgmr.msra.gmra.mxu2 %v1061_v13 }
 0x560   :  { %v1101_v15 = vpop.f32.mrf.mxu2 }
 0x561   :  { %v1102_v16 = vadd.f32 %v1241_v14, %v1101_v15 }
 0x563   :  { %1104 = vst [vmem:[%s2240_s7] sm:$0xff] %v1102_v16 }

</bundles_post_ra>
